<compile_context>
chip_gen: v6e
topology: v6e:2x2x1
jax: 0.10.0
libtpu: 0.0.40
codegen_flags: <defaults>
</compile_context>

<pallas_src>
import jax
import jax.numpy as jnp
from jax.experimental import pallas as pl
from jax.experimental.pallas import tpu as pltpu

EPS = 1e-3  # BatchNorm2d(eps=0.001)


def _dwconv_bn_kernel(x_ref, w_ref, g_ref, b_ref, o_ref, xpad_ref):
    # x_ref    : (N, H, W, CB)       unpadded NHWC input block
    # w_ref    : (9, CB)             depthwise 3x3 taps, row-major (ky*3+kx)
    # g_ref    : (1, CB)             batchnorm gamma
    # b_ref    : (1, CB)             batchnorm beta
    # o_ref    : (N, H, W, CB)
    # xpad_ref : (N, H+2, W+2, CB)   f32 VMEM scratch for in-kernel zero-pad
    N, H, W, CB = x_ref.shape

    # In-kernel spatial zero-padding (replaces wrapper jnp.pad => no extra
    # HBM round trip for the padded activation).
    xpad_ref[...] = jnp.zeros_like(xpad_ref)
    xpad_ref[:, 1:H + 1, 1:W + 1, :] = x_ref[...].astype(jnp.float32)

    w = w_ref[...].astype(jnp.float32)  # (9, CB), loaded once

    # Depthwise 3x3 conv: materialize only the 3 W-axis (sublane) shifts,
    # then take cheap H-axis slices for the 3 vertical taps of each.
    acc = None
    for dx in range(3):
        xs = xpad_ref[:, :, dx:dx + W, :]            # (N, H+2, W, CB)
        for dy in range(3):
            contrib = xs[:, dy:dy + H, :, :] * w[dy * 3 + dx, :]
            acc = contrib if acc is None else acc + contrib

    # BatchNorm2d, training-mode (biased) batch stats over (N, H, W).
    # Single fused pass: per-channel sum and sum-of-squares.
    cnt = jnp.float32(N * H * W)
    s1 = jnp.sum(acc, axis=(0, 1, 2), keepdims=True)          # (1,1,1,CB)
    s2 = jnp.sum(acc * acc, axis=(0, 1, 2), keepdims=True)    # (1,1,1,CB)
    mean = s1 / cnt
    var = jnp.maximum(s2 / cnt - mean * mean, 0.0)
    inv = jax.lax.rsqrt(var + EPS)
    scale = inv * g_ref[0, :]
    shift = b_ref[0, :] - mean * scale
    o_ref[...] = (acc * scale + shift).astype(o_ref.dtype)


def dwconv_bn(x_nchw, w_dw, gamma, beta, *, cb=128):
    """x_nchw: (N, C, H, W); w_dw: (C, 1, 3, 3); gamma/beta: (C,)."""
    N, C, H, W = x_nchw.shape

    # Glue: NCHW -> NHWC (C on the lane axis), weights repacked as (9, C).
    x_nhwc = jnp.transpose(x_nchw, (0, 2, 3, 1))
    w9c = jnp.transpose(w_dw.reshape(C, 9), (1, 0))            # (9, C)
    g2 = gamma.reshape(1, C)
    b2 = beta.reshape(1, C)

    # Channel grid of `cb`-lane blocks; pad C up to a multiple of cb if needed
    # (per-channel BN stats keep padded lanes fully independent).
    num_blocks = pl.cdiv(C, cb)
    Cp = num_blocks * cb
    if Cp != C:
        pad = Cp - C
        x_nhwc = jnp.pad(x_nhwc, ((0, 0), (0, 0), (0, 0), (0, pad)))
        w9c = jnp.pad(w9c, ((0, 0), (0, pad)))
        g2 = jnp.pad(g2, ((0, 0), (0, pad)))
        b2 = jnp.pad(b2, ((0, 0), (0, pad)))

    out_nhwc = pl.pallas_call(
        _dwconv_bn_kernel,
        out_shape=jax.ShapeDtypeStruct((N, H, W, Cp), x_nchw.dtype),
        grid=(num_blocks,),
        in_specs=[
            pl.BlockSpec((N, H, W, cb), lambda c: (0, 0, 0, c)),
            pl.BlockSpec((9, cb), lambda c: (0, c)),
            pl.BlockSpec((1, cb), lambda c: (0, c)),
            pl.BlockSpec((1, cb), lambda c: (0, c)),
        ],
        out_specs=pl.BlockSpec((N, H, W, cb), lambda c: (0, 0, 0, c)),
        scratch_shapes=[pltpu.VMEM((N, H + 2, W + 2, cb), jnp.float32)],
        compiler_params=pltpu.CompilerParams(
            dimension_semantics=("parallel",),
            vmem_limit_bytes=32 * 1024 * 1024,
        ),
    )(x_nhwc, w9c, g2, b2)

    if Cp != C:
        out_nhwc = out_nhwc[..., :C]
    return jnp.transpose(out_nhwc, (0, 3, 1, 2))  # back to NCHW


def _reference(x_nchw, w_dw, gamma, beta):
    """Pure-JAX reference: depthwise conv + training-mode batchnorm."""
    C = x_nchw.shape[1]
    y = jax.lax.conv_general_dilated(
        x_nchw, w_dw,
        window_strides=(1, 1), padding=((1, 1), (1, 1)),
        dimension_numbers=("NCHW", "OIHW", "NCHW"),
        feature_group_count=C,
    )
    mean = jnp.mean(y, axis=(0, 2, 3), keepdims=True)
    var = jnp.mean((y - mean) ** 2, axis=(0, 2, 3), keepdims=True)
    yhat = (y - mean) * jax.lax.rsqrt(var + EPS)
    return yhat * gamma.reshape(1, C, 1, 1) + beta.reshape(1, C, 1, 1)


if __name__ == "__main__":
    # Small shapes consistent with the module (original: 1x672x14x14).
    # C=256 -> two 128-lane channel blocks, exercising the pipelined grid.
    N, C, H, W = 1, 256, 14, 14

    key = jax.random.PRNGKey(0)
    kx, kw, kg, kb = jax.random.split(key, 4)
    x = jax.random.normal(kx, (N, C, H, W), dtype=jnp.float32)
    w = jax.random.normal(kw, (C, 1, 3, 3), dtype=jnp.float32) * 0.1
    gamma = 1.0 + 0.1 * jax.random.normal(kg, (C,), dtype=jnp.float32)
    beta = 0.1 * jax.random.normal(kb, (C,), dtype=jnp.float32)

    out = dwconv_bn(x, w, gamma, beta)
    out = jax.block_until_ready(out)

    ref = _reference(x, w, gamma, beta)
    assert out.shape == (N, C, H, W)
    assert jnp.allclose(out, ref, atol=5e-4, rtol=5e-4), (
        float(jnp.max(jnp.abs(out - ref))))

    # TODO(synk): BatchNorm running_mean/running_var state update (momentum=0.01,
    # unbiased var) is a training-state side effect and is not reproduced here.
    print("KERNEL_OK")
</pallas_src>

<mosaic_0001>
module attributes {stable_mosaic.version = 11 : i64} {
  func.func @_dwconv_bn_kernel(%arg0: i32, %arg1: memref<1x14x14x128xf32, #tpu.memory_space<vmem>>, %arg2: memref<9x128xf32, #tpu.memory_space<vmem>>, %arg3: memref<1x128xf32, #tpu.memory_space<vmem>>, %arg4: memref<1x128xf32, #tpu.memory_space<vmem>>, %arg5: memref<1x14x14x128xf32, #tpu.memory_space<vmem>>, %arg6: memref<1x16x16x128xf32, #tpu.memory_space<vmem>>) attributes {dimension_semantics = [#tpu.dimension_semantics<parallel>], iteration_bounds = array<i64: 2>, scalar_prefetch = 0 : i64, scratch_operands = 1 : i64, tpu.core_type = #tpu.core_type<tc>, window_params = [{transform_indices = @transform_0, window_bounds = array<i64: 1, 14, 14, 128>}, {transform_indices = @transform_1, window_bounds = array<i64: 9, 128>}, {transform_indices = @transform_2, window_bounds = array<i64: 1, 128>}, {transform_indices = @transform_3, window_bounds = array<i64: 1, 128>}, {transform_indices = @transform_4, window_bounds = array<i64: 1, 14, 14, 128>}]} {
    %cst = arith.constant 0.000000e+00 : f32
    %0 = vector.broadcast %cst : f32 to vector<1x16x16x128xf32>
    %c0 = arith.constant 0 : index
    %c0_0 = arith.constant 0 : index
    %c0_1 = arith.constant 0 : index
    %c0_2 = arith.constant 0 : index
    %1 = vector.load %arg6[%c0, %c0_0, %c0_1, %c0_2] : memref<1x16x16x128xf32, #tpu.memory_space<vmem>>, vector<1x16x16x128xf32>
    tpu.vector_store %arg6[%c0, %c0_0, %c0_1, %c0_2], %0 {strides = array<i32>} : memref<1x16x16x128xf32, #tpu.memory_space<vmem>>, vector<1x16x16x128xf32>,
    %c0_3 = arith.constant 0 : index
    %c0_4 = arith.constant 0 : index
    %c0_5 = arith.constant 0 : index
    %c0_6 = arith.constant 0 : index
    %2 = vector.load %arg1[%c0_3, %c0_4, %c0_5, %c0_6] : memref<1x14x14x128xf32, #tpu.memory_space<vmem>>, vector<1x14x14x128xf32>
    %c0_7 = arith.constant 0 : index
    %c1 = arith.constant 1 : index
    %c1_8 = arith.constant 1 : index
    %c0_9 = arith.constant 0 : index
    %3 = vector.load %arg6[%c0_7, %c1, %c1_8, %c0_9] : memref<1x16x16x128xf32, #tpu.memory_space<vmem>>, vector<1x14x14x128xf32>
    tpu.vector_store %arg6[%c0_7, %c1, %c1_8, %c0_9], %2 {strides = array<i32>} : memref<1x16x16x128xf32, #tpu.memory_space<vmem>>, vector<1x14x14x128xf32>,
    %c0_10 = arith.constant 0 : index
    %c0_11 = arith.constant 0 : index
    %4 = vector.load %arg2[%c0_10, %c0_11] : memref<9x128xf32, #tpu.memory_space<vmem>>, vector<9x128xf32>
    %c0_12 = arith.constant 0 : index
    %c0_13 = arith.constant 0 : index
    %c0_14 = arith.constant 0 : index
    %c0_15 = arith.constant 0 : index
    %5 = vector.load %arg6[%c0_12, %c0_13, %c0_14, %c0_15] : memref<1x16x16x128xf32, #tpu.memory_space<vmem>>, vector<1x16x14x128xf32>
    %6 = vector.extract_strided_slice %5 {offsets = [0, 0, 0, 0], sizes = [1, 14, 14, 128], strides = [1, 1, 1, 1]} : vector<1x16x14x128xf32> to vector<1x14x14x128xf32>
    %7 = vector.extract_strided_slice %4 {offsets = [0, 0], sizes = [1, 128], strides = [1, 1]} : vector<9x128xf32> to vector<1x128xf32>
    %8 = vector.shape_cast %7 : vector<1x128xf32> to vector<128xf32>
    %9 = vector.shape_cast %8 : vector<128xf32> to vector<1x1x1x128xf32>
    %10 = vector.broadcast %9 : vector<1x1x1x128xf32> to vector<1x14x14x128xf32>
    %11 = arith.mulf %6, %10 : vector<1x14x14x128xf32>
    %12 = vector.extract_strided_slice %5 {offsets = [0, 1, 0, 0], sizes = [1, 14, 14, 128], strides = [1, 1, 1, 1]} : vector<1x16x14x128xf32> to vector<1x14x14x128xf32>
    %13 = vector.extract_strided_slice %4 {offsets = [3, 0], sizes = [1, 128], strides = [1, 1]} : vector<9x128xf32> to vector<1x128xf32>
    %14 = vector.shape_cast %13 : vector<1x128xf32> to vector<128xf32>
    %15 = vector.shape_cast %14 : vector<128xf32> to vector<1x1x1x128xf32>
    %16 = vector.broadcast %15 : vector<1x1x1x128xf32> to vector<1x14x14x128xf32>
    %17 = arith.mulf %12, %16 : vector<1x14x14x128xf32>
    %18 = arith.addf %11, %17 : vector<1x14x14x128xf32>
    %19 = vector.extract_strided_slice %5 {offsets = [0, 2, 0, 0], sizes = [1, 14, 14, 128], strides = [1, 1, 1, 1]} : vector<1x16x14x128xf32> to vector<1x14x14x128xf32>
    %20 = vector.extract_strided_slice %4 {offsets = [6, 0], sizes = [1, 128], strides = [1, 1]} : vector<9x128xf32> to vector<1x128xf32>
    %21 = vector.shape_cast %20 : vector<1x128xf32> to vector<128xf32>
    %22 = vector.shape_cast %21 : vector<128xf32> to vector<1x1x1x128xf32>
    %23 = vector.broadcast %22 : vector<1x1x1x128xf32> to vector<1x14x14x128xf32>
    %24 = arith.mulf %19, %23 : vector<1x14x14x128xf32>
    %25 = arith.addf %18, %24 : vector<1x14x14x128xf32>
    %c0_16 = arith.constant 0 : index
    %c0_17 = arith.constant 0 : index
    %c1_18 = arith.constant 1 : index
    %c0_19 = arith.constant 0 : index
    %26 = vector.load %arg6[%c0_16, %c0_17, %c1_18, %c0_19] : memref<1x16x16x128xf32, #tpu.memory_space<vmem>>, vector<1x16x14x128xf32>
    %27 = vector.extract_strided_slice %26 {offsets = [0, 0, 0, 0], sizes = [1, 14, 14, 128], strides = [1, 1, 1, 1]} : vector<1x16x14x128xf32> to vector<1x14x14x128xf32>
    %28 = vector.extract_strided_slice %4 {offsets = [1, 0], sizes = [1, 128], strides = [1, 1]} : vector<9x128xf32> to vector<1x128xf32>
    %29 = vector.shape_cast %28 : vector<1x128xf32> to vector<128xf32>
    %30 = vector.shape_cast %29 : vector<128xf32> to vector<1x1x1x128xf32>
    %31 = vector.broadcast %30 : vector<1x1x1x128xf32> to vector<1x14x14x128xf32>
    %32 = arith.mulf %27, %31 : vector<1x14x14x128xf32>
    %33 = arith.addf %25, %32 : vector<1x14x14x128xf32>
    %34 = vector.extract_strided_slice %26 {offsets = [0, 1, 0, 0], sizes = [1, 14, 14, 128], strides = [1, 1, 1, 1]} : vector<1x16x14x128xf32> to vector<1x14x14x128xf32>
    %35 = vector.extract_strided_slice %4 {offsets = [4, 0], sizes = [1, 128], strides = [1, 1]} : vector<9x128xf32> to vector<1x128xf32>
    %36 = vector.shape_cast %35 : vector<1x128xf32> to vector<128xf32>
    %37 = vector.shape_cast %36 : vector<128xf32> to vector<1x1x1x128xf32>
    %38 = vector.broadcast %37 : vector<1x1x1x128xf32> to vector<1x14x14x128xf32>
    %39 = arith.mulf %34, %38 : vector<1x14x14x128xf32>
    %40 = arith.addf %33, %39 : vector<1x14x14x128xf32>
    %41 = vector.extract_strided_slice %26 {offsets = [0, 2, 0, 0], sizes = [1, 14, 14, 128], strides = [1, 1, 1, 1]} : vector<1x16x14x128xf32> to vector<1x14x14x128xf32>
    %42 = vector.extract_strided_slice %4 {offsets = [7, 0], sizes = [1, 128], strides = [1, 1]} : vector<9x128xf32> to vector<1x128xf32>
    %43 = vector.shape_cast %42 : vector<1x128xf32> to vector<128xf32>
    %44 = vector.shape_cast %43 : vector<128xf32> to vector<1x1x1x128xf32>
    %45 = vector.broadcast %44 : vector<1x1x1x128xf32> to vector<1x14x14x128xf32>
    %46 = arith.mulf %41, %45 : vector<1x14x14x128xf32>
    %47 = arith.addf %40, %46 : vector<1x14x14x128xf32>
    %c0_20 = arith.constant 0 : index
    %c0_21 = arith.constant 0 : index
    %c2 = arith.constant 2 : index
    %c0_22 = arith.constant 0 : index
    %48 = vector.load %arg6[%c0_20, %c0_21, %c2, %c0_22] : memref<1x16x16x128xf32, #tpu.memory_space<vmem>>, vector<1x16x14x128xf32>
    %49 = vector.extract_strided_slice %48 {offsets = [0, 0, 0, 0], sizes = [1, 14, 14, 128], strides = [1, 1, 1, 1]} : vector<1x16x14x128xf32> to vector<1x14x14x128xf32>
    %50 = vector.extract_strided_slice %4 {offsets = [2, 0], sizes = [1, 128], strides = [1, 1]} : vector<9x128xf32> to vector<1x128xf32>
    %51 = vector.shape_cast %50 : vector<1x128xf32> to vector<128xf32>
    %52 = vector.shape_cast %51 : vector<128xf32> to vector<1x1x1x128xf32>
    %53 = vector.broadcast %52 : vector<1x1x1x128xf32> to vector<1x14x14x128xf32>
    %54 = arith.mulf %49, %53 : vector<1x14x14x128xf32>
    %55 = arith.addf %47, %54 : vector<1x14x14x128xf32>
    %56 = vector.extract_strided_slice %48 {offsets = [0, 1, 0, 0], sizes = [1, 14, 14, 128], strides = [1, 1, 1, 1]} : vector<1x16x14x128xf32> to vector<1x14x14x128xf32>
    %57 = vector.extract_strided_slice %4 {offsets = [5, 0], sizes = [1, 128], strides = [1, 1]} : vector<9x128xf32> to vector<1x128xf32>
    %58 = vector.shape_cast %57 : vector<1x128xf32> to vector<128xf32>
    %59 = vector.shape_cast %58 : vector<128xf32> to vector<1x1x1x128xf32>
    %60 = vector.broadcast %59 : vector<1x1x1x128xf32> to vector<1x14x14x128xf32>
    %61 = arith.mulf %56, %60 : vector<1x14x14x128xf32>
    %62 = arith.addf %55, %61 : vector<1x14x14x128xf32>
    %63 = vector.extract_strided_slice %48 {offsets = [0, 2, 0, 0], sizes = [1, 14, 14, 128], strides = [1, 1, 1, 1]} : vector<1x16x14x128xf32> to vector<1x14x14x128xf32>
    %64 = vector.extract_strided_slice %4 {offsets = [8, 0], sizes = [1, 128], strides = [1, 1]} : vector<9x128xf32> to vector<1x128xf32>
    %65 = vector.shape_cast %64 : vector<1x128xf32> to vector<128xf32>
    %66 = vector.shape_cast %65 : vector<128xf32> to vector<1x1x1x128xf32>
    %67 = vector.broadcast %66 : vector<1x1x1x128xf32> to vector<1x14x14x128xf32>
    %68 = arith.mulf %63, %67 : vector<1x14x14x128xf32>
    %69 = arith.addf %62, %68 : vector<1x14x14x128xf32>
    %cst_23 = arith.constant dense<0.000000e+00> : vector<128xf32>
    %70 = vector.multi_reduction <add>, %69, %cst_23 [0, 1, 2] : vector<1x14x14x128xf32> to vector<128xf32>
    %71 = vector.shape_cast %70 : vector<128xf32> to vector<1x1x1x128xf32>
    %72 = arith.mulf %69, %69 : vector<1x14x14x128xf32>
    %cst_24 = arith.constant dense<0.000000e+00> : vector<128xf32>
    %73 = vector.multi_reduction <add>, %72, %cst_24 [0, 1, 2] : vector<1x14x14x128xf32> to vector<128xf32>
    %74 = vector.shape_cast %73 : vector<128xf32> to vector<1x1x1x128xf32>
    %cst_25 = arith.constant 1.960000e+02 : f32
    %75 = vector.broadcast %cst_25 : f32 to vector<1x1x1x128xf32>
    %76 = arith.divf %71, %75 : vector<1x1x1x128xf32>
    %cst_26 = arith.constant 1.960000e+02 : f32
    %77 = vector.broadcast %cst_26 : f32 to vector<1x1x1x128xf32>
    %78 = arith.divf %74, %77 : vector<1x1x1x128xf32>
    %79 = arith.mulf %76, %76 : vector<1x1x1x128xf32>
    %80 = arith.subf %78, %79 : vector<1x1x1x128xf32>
    %cst_27 = arith.constant 0.000000e+00 : f32
    %81 = vector.broadcast %cst_27 : f32 to vector<1x1x1x128xf32>
    %82 = arith.maximumf %80, %81 : vector<1x1x1x128xf32>
    %cst_28 = arith.constant 1.000000e-03 : f32
    %83 = vector.broadcast %cst_28 : f32 to vector<1x1x1x128xf32>
    %84 = arith.addf %82, %83 : vector<1x1x1x128xf32>
    %85 = math.rsqrt %84 : vector<1x1x1x128xf32>
    %c0_29 = arith.constant 0 : index
    %c0_30 = arith.constant 0 : index
    %86 = vector.load %arg3[%c0_29, %c0_30] : memref<1x128xf32, #tpu.memory_space<vmem>>, vector<1x128xf32>
    %87 = vector.shape_cast %86 : vector<1x128xf32> to vector<128xf32>
    %88 = vector.shape_cast %87 : vector<128xf32> to vector<1x1x1x128xf32>
    %89 = arith.mulf %85, %88 : vector<1x1x1x128xf32>
    %c0_31 = arith.constant 0 : index
    %c0_32 = arith.constant 0 : index
    %90 = vector.load %arg4[%c0_31, %c0_32] : memref<1x128xf32, #tpu.memory_space<vmem>>, vector<1x128xf32>
    %91 = vector.shape_cast %90 : vector<1x128xf32> to vector<128xf32>
    %92 = arith.mulf %76, %89 : vector<1x1x1x128xf32>
    %93 = vector.shape_cast %91 : vector<128xf32> to vector<1x1x1x128xf32>
    %94 = arith.subf %93, %92 : vector<1x1x1x128xf32>
    %95 = vector.broadcast %89 : vector<1x1x1x128xf32> to vector<1x14x14x128xf32>
    %96 = arith.mulf %69, %95 : vector<1x14x14x128xf32>
    %97 = vector.broadcast %94 : vector<1x1x1x128xf32> to vector<1x14x14x128xf32>
    %98 = arith.addf %96, %97 : vector<1x14x14x128xf32>
    %c0_33 = arith.constant 0 : index
    %c0_34 = arith.constant 0 : index
    %c0_35 = arith.constant 0 : index
    %c0_36 = arith.constant 0 : index
    %99 = vector.load %arg5[%c0_33, %c0_34, %c0_35, %c0_36] : memref<1x14x14x128xf32, #tpu.memory_space<vmem>>, vector<1x14x14x128xf32>
    tpu.vector_store %arg5[%c0_33, %c0_34, %c0_35, %c0_36], %98 {strides = array<i32>} : memref<1x14x14x128xf32, #tpu.memory_space<vmem>>, vector<1x14x14x128xf32>,
    return
  }
  func.func @transform_0(%arg0: i32) -> (i32, i32, i32, i32) {
    %c0_i32 = arith.constant 0 : i32
    %c0_i32_0 = arith.constant 0 : i32
    %c0_i32_1 = arith.constant 0 : i32
    %c0_i32_2 = arith.constant 0 : i32
    return %c0_i32, %c0_i32_0, %c0_i32_1, %arg0 : i32, i32, i32, i32
  }
  func.func @transform_1(%arg0: i32) -> (i32, i32) {
    %c0_i32 = arith.constant 0 : i32
    %c0_i32_0 = arith.constant 0 : i32
    return %c0_i32, %arg0 : i32, i32
  }
  func.func @transform_2(%arg0: i32) -> (i32, i32) {
    %c0_i32 = arith.constant 0 : i32
    %c0_i32_0 = arith.constant 0 : i32
    return %c0_i32, %arg0 : i32, i32
  }
  func.func @transform_3(%arg0: i32) -> (i32, i32) {
    %c0_i32 = arith.constant 0 : i32
    %c0_i32_0 = arith.constant 0 : i32
    return %c0_i32, %arg0 : i32, i32
  }
  func.func @transform_4(%arg0: i32) -> (i32, i32, i32, i32) {
    %c0_i32 = arith.constant 0 : i32
    %c0_i32_0 = arith.constant 0 : i32
    %c0_i32_1 = arith.constant 0 : i32
    %c0_i32_2 = arith.constant 0 : i32
    return %c0_i32, %c0_i32_0, %c0_i32_1, %arg0 : i32, i32, i32, i32
  }
}

</mosaic_0001>

<bundles_post_ra>
// kernel: tpu_custom_call.1
= control target key start
LH: loop header
LB: loop body
LE: loop exit
PB: predicated region body
PF: predicated region fallthrough
CT: control target
= control target key end

     0   :  { %s1686_s15 = smov 0   ;;  %s1688_s16 = smov 0   ;;  %s2843_s0 = inlined_call_operand.vmem [shape: f32[1,14,14,256], index: 0, kind: input, shape index: {}]   ;;  %s2844_s1 = inlined_call_operand.vmem [shape: f32[9,256], index: 1, kind: input, shape index: {}]   ;;  %s2845_s2 = inlined_call_operand.vmem [shape: f32[1,256], index: 2, kind: input, shape index: {}]   ;;  %s2846_s3 = inlined_call_operand.vmem [shape: f32[1,256], index: 3, kind: input, shape index: {}]   ;;  %s2847_s4 = inlined_call_operand.vmem [shape: f32[1,14,14,256], index: 4, kind: output, shape index: {}]  }
   0x1   :  { %s1690_s17 = smov 0  }
   0x2 LB: > { %s1702_s18 = sadd.s32 4294967295, %s1658_s17   ;;  %s1705_s19 = sadd.s32 1, %s1658_s17   ;;  %s1658_s17 = sphi %s1690_s17, %s2940_s17   ;;  %s1654_s16 = sphi %s1688_s16, %s2939_s16   ;;  %s1650_s15 = sphi %s1686_s15, %s2938_s15  }
   0x3   : > { %s18_s20 = ssub.s32 %s1658_s17, %s1705_s19  ;;  %s21_s21 = sadd.s32 1, %s1654_s16 }
   0x4   : > { %p19_p0 = scmp.eq.s32.totalorder %s18_s20, 0  ;;  %p28_p1 = scmp.ne.s32.totalorder %s1654_s16, %s1650_s15 }
   0x5   : > { %p29_p2 = scmp.eq.s32.totalorder %s1658_s17, 0  ;;  %p136_p3 = scmp.eq.s32.totalorder %s1702_s18, 1 }
   0x6   : > { %s1715_s22 = scalar_select %p19_p0, %s1654_s16, %s21_s21  }
   0x7   : > { %p1717_p4 = por %p29_p2, %p28_p1  ;;  %p1721_p5 = por %p136_p3, %p28_p1 }
   0x8   : > { %p1596_p6 = scmp.ge.s32.totalorder %s1658_s17, 2 }
   0xa   : > { %158 = sbr.rel (%p1596_p6) target bundleno = 38 (0x26), region = 16 }
   0xf   : > { %161 = sbr.rel (!%p1717_p4) target bundleno = 33 (0x21), region = 20  ;;  %s163_s25 = sand.u32 (%p1717_p4), 1, %s1654_s16  }
  0x10   : > { %s1597_s26 = sshll.u32 (%p1717_p4), %s1658_s17, 3  ;;  %s1606_s27 = smul.u32 (%p1717_p4), 224, %s163_s25 }
  0x11   : > { %s1733_s30 = scalar_lea.vmem (%p1717_p4), %s2843_s0, %s1597_s26 }
  0x12   : > { %v250_v0 = vld [vmem:[%s1733_s30] sm:$0xff] (%p1717_p4)  ;;  %v252_v1 = vld [vmem:[%s1733_s30 + $0x10] sm:$0xff] (%p1717_p4)  ;;  %s1741_s5 = scalar_lea.vmem (%p1717_p4), [#allocation3], %s1606_s27 }
  0x13   : > { %v254_v2 = vld [vmem:[%s1733_s30 + $0x20] sm:$0xff] (%p1717_p4)  ;;  %v256_v3 = vld [vmem:[%s1733_s30 + $0x30] sm:$0xff] (%p1717_p4)  ;;  %251 = vst [vmem:[%s1741_s5] sm:$0xff] (%p1717_p4), %v250_v0  ;;  %253 = vst [vmem:[%s1741_s5 + $0x8] sm:$0xff] (%p1717_p4), %v252_v1 }
  0x14   : > { %v258_v4 = vld [vmem:[%s1733_s30 + $0x40] sm:$0xff]  ;;  %v260_v5 = vld [vmem:[%s1733_s30 + $0x50] sm:$0xff]  ;;  %255 = vst [vmem:[%s1741_s5 + $0x10] sm:$0xff] %v254_v2  ;;  %257 = vst [vmem:[%s1741_s5 + $0x18] sm:$0xff] %v256_v3 }
  0x15   : > { %259 = vst [vmem:[%s1741_s5 + $0x20] sm:$0xff] %v258_v4  ;;  %261 = vst [vmem:[%s1741_s5 + $0x28] sm:$0xff] %v260_v5  ;;  %v262_v6 = vld [vmem:[%s1733_s30 + $0x60] sm:$0xff]  ;;  %v264_v7 = vld [vmem:[%s1733_s30 + $0x70] sm:$0xff] }
  0x16   : > { %v266_v8 = vld [vmem:[%s1733_s30 + $0x80] sm:$0xff]  ;;  %263 = vst [vmem:[%s1741_s5 + $0x30] sm:$0xff] %v262_v6  ;;  %265 = vst [vmem:[%s1741_s5 + $0x38] sm:$0xff] %v264_v7  ;;  %v268_v9 = vld [vmem:[%s1733_s30 + $0x90] sm:$0xff] }
  0x17   : > { %267 = vst [vmem:[%s1741_s5 + $0x40] sm:$0xff] %v266_v8  ;;  %v270_v10 = vld [vmem:[%s1733_s30 + $0xa0] sm:$0xff]  ;;  %v272_v11 = vld [vmem:[%s1733_s30 + $0xb0] sm:$0xff]  ;;  %269 = vst [vmem:[%s1741_s5 + $0x48] sm:$0xff] %v268_v9 }
  0x18   : > { %271 = vst [vmem:[%s1741_s5 + $0x50] sm:$0xff] %v270_v10  ;;  %273 = vst [vmem:[%s1741_s5 + $0x58] sm:$0xff] %v272_v11  ;;  %v274_v12 = vld [vmem:[%s1733_s30 + $0xc0] sm:$0xff]  ;;  %v276_v13 = vld [vmem:[%s1733_s30 + $0xd0] sm:$0xff] }
  0x19   : > { %v278_v14 = vld [vmem:[%s1733_s30 + $0xe0] sm:$0xff]  ;;  %275 = vst [vmem:[%s1741_s5 + $0x60] sm:$0xff] %v274_v12  ;;  %277 = vst [vmem:[%s1741_s5 + $0x68] sm:$0xff] %v276_v13  ;;  %v280_v15 = vld [vmem:[%s1733_s30 + $0xf0] sm:$0xff] }
  0x1a   : > { %279 = vst [vmem:[%s1741_s5 + $0x70] sm:$0xff] %v278_v14  ;;  %v282_v16 = vld [vmem:[%s1733_s30 + $0x100] sm:$0xff]  ;;  %v284_v17 = vld [vmem:[%s1733_s30 + $0x110] sm:$0xff]  ;;  %281 = vst [vmem:[%s1741_s5 + $0x78] sm:$0xff] %v280_v15 }
  0x1b   : > { %283 = vst [vmem:[%s1741_s5 + $0x80] sm:$0xff] %v282_v16  ;;  %285 = vst [vmem:[%s1741_s5 + $0x88] sm:$0xff] %v284_v17  ;;  %v286_v18 = vld [vmem:[%s1733_s30 + $0x120] sm:$0xff]  ;;  %v288_v19 = vld [vmem:[%s1733_s30 + $0x130] sm:$0xff] }
  0x1c   : > { %v290_v20 = vld [vmem:[%s1733_s30 + $0x140] sm:$0xff]  ;;  %287 = vst [vmem:[%s1741_s5 + $0x90] sm:$0xff] %v286_v18  ;;  %289 = vst [vmem:[%s1741_s5 + $0x98] sm:$0xff] %v288_v19  ;;  %v292_v21 = vld [vmem:[%s1733_s30 + $0x150] sm:$0xff] }
  0x1d   : > { %291 = vst [vmem:[%s1741_s5 + $0xa0] sm:$0xff] %v290_v20  ;;  %v294_v22 = vld [vmem:[%s1733_s30 + $0x160] sm:$0xff]  ;;  %v296_v23 = vld [vmem:[%s1733_s30 + $0x170] sm:$0xff]  ;;  %293 = vst [vmem:[%s1741_s5 + $0xa8] sm:$0xff] %v292_v21 }
  0x1e   : > { %295 = vst [vmem:[%s1741_s5 + $0xb0] sm:$0xff] %v294_v22  ;;  %297 = vst [vmem:[%s1741_s5 + $0xb8] sm:$0xff] %v296_v23  ;;  %v298_v24 = vld [vmem:[%s1733_s30 + $0x180] sm:$0xff]  ;;  %v300_v25 = vld [vmem:[%s1733_s30 + $0x190] sm:$0xff] }
  0x1f   : > { %v302_v26 = vld [vmem:[%s1733_s30 + $0x1a0] sm:$0xff]  ;;  %299 = vst [vmem:[%s1741_s5 + $0xc0] sm:$0xff] %v298_v24  ;;  %301 = vst [vmem:[%s1741_s5 + $0xc8] sm:$0xff] %v300_v25  ;;  %v304_v27 = vld [vmem:[%s1733_s30 + $0x1b0] sm:$0xff] }
  0x20   : > { %303 = vst [vmem:[%s1741_s5 + $0xd0] sm:$0xff] %v302_v26  ;;  %305 = vst [vmem:[%s1741_s5 + $0xd8] sm:$0xff] %v304_v27 }
  0x21 PF: > { %311 = sbr.rel (!%p1717_p4) target bundleno = 38 (0x26), region = 58  ;;  %s313_s6 = sand.u32 (%p1717_p4), 1, %s1654_s16  }
  0x22   : > { %s1599_s7 = sshll.u32 (%p1717_p4), %s1658_s17, 3  ;;  %s1598_s8 = sshll.u32 (%p1717_p4), %s313_s6, 4 }
  0x23   : > { %s317_s11 = scalar_lea.vmem (%p1717_p4), %s2844_s1, %s1599_s7  ;;  %s315_s12 = scalar_lea.vmem (%p1717_p4), [#allocation4], %s1598_s8 }
  0x24   : > { %v348_v28 = vld [vmem:[%s317_s11] sm:$0xff] (%p1717_p4)  ;;  %v350_v29 = vld [vmem:[%s317_s11 + $0x10] sm:$0xff] (%p1717_p4) }
  0x25   : > { %349 = vst [vmem:[%s315_s12] sm:$0xff] (%p1717_p4), %v348_v28  ;;  %351 = vst [vmem:[%s315_s12 + $0x8] sm:$0xff] (%p1717_p4), %v350_v29 }
  0x26 PF: > { %p1600_p7 = scmp.ge.s32.totalorder %s1658_s17, 1  ;;  %p368_p8 = scmp.lt.s32.totalorder %s1658_s17, 3 }
  0x28   : > { %p369_p9 = pnand %p1600_p7, %p368_p8 }
  0x2a   : > { %372 = sbr.rel (%p369_p9) target bundleno = 311 (0x137), region = 104 }
  0x2f   : > { %s375_s13 = sand.u32 1, %s1650_s15   ;;  %v545_v30 = vlaneseq  ;;  %v1660_v31 = vmov 0.0   ;;  %vm1121_vm0 = vcmask 1045504   ;;  %p416_p10 = scmp.lt.s32.totalorder %s1702_s18, 1 }
  0x30   : > { %424 = vst [vmem:[#allocation2 + $0x10] sm:$0xff] %v1660_v31  ;;  %422 = vst [vmem:[#allocation2] sm:$0xff] %v1660_v31  ;;  %s1601_s14 = sshll.u32 %s375_s13, 4  ;;  %s1807_s17 = smul.u32 224, %s375_s13 }
  0x31   : > { %423 = vst [vmem:[#allocation2 + $0x8] sm:$0xff] %v1660_v31  ;;  %425 = vst [vmem:[#allocation2 + $0x18] sm:$0xff] %v1660_v31  ;;  %v1809_v32 = vshrl.u32 %v545_v30, 7  ;;  %s1811_s20 = scalar_lea.vmem [#allocation4], %s1601_s14  ;;  %s1603_s5 = sshll.u32 (%p1721_p5), %s1702_s18, 3 }
  0x32   : > { %426 = vst [vmem:[#allocation2 + $0x20] sm:$0xff] %v1660_v31  ;;  %427 = vst [vmem:[#allocation2 + $0x28] sm:$0xff] %v1660_v31  ;;  %v1814_v33 = vld [vmem:[%s1811_s20] sm:$0xff]  ;;  %s1820_s21 = scalar_lea.vmem [#allocation3], %s1807_s17  ;;  %s2691_s30 = scalar_lea.vmem [#allocation5], %s1807_s17 }
  0x33   : > { %428 = vst [vmem:[#allocation2 + $0x30] sm:$0xff] %v1660_v31  ;;  %429 = vst [vmem:[#allocation2 + $0x38] sm:$0xff] %v1660_v31  ;;  %v1817_v34 = vsub.s32 0, %v1809_v32  ;;  %v454_v35 = vld [vmem:[%s1820_s21] sm:$0xff]  ;;  %v455_v36 = vld [vmem:[%s1820_s21 + $0x8] sm:$0x3f]  ;;  %s2778_s8 = scalar_lea.vmem (%p1721_p5), %s2847_s4, %s1603_s5 }
  0x34   : > { %430 = vst [vmem:[#allocation2 + $0x40] sm:$0xff] %v1660_v31  ;;  %431 = vst [vmem:[#allocation2 + $0x48] sm:$0xff] %v1660_v31  ;;  %v456_v37 = vld [vmem:[%s1820_s21 + $0x10] sm:$0xff]  ;;  %v457_v38 = vld [vmem:[%s1820_s21 + $0x18] sm:$0x3f]  ;;  %v639_v41 = vsub.s32 6, %v1809_v32 }
  0x35   : > { %432 = vst [vmem:[#allocation2 + $0x50] sm:$0xff] %v1660_v31  ;;  %433 = vst [vmem:[#allocation2 + $0x58] sm:$0xff] %v1660_v31  ;;  %v458_v39 = vld [vmem:[%s1820_s21 + $0x20] sm:$0xff]  ;;  %v459_v40 = vld [vmem:[%s1820_s21 + $0x28] sm:$0x3f]  ;;  %v1831_v42 = vrot.slane %v1814_v33, %v1817_v34  ;;  %v731_v43 = vsub.s32 1, %v1809_v32 }
  0x36   : > { %434 = vst [vmem:[#allocation2 + $0x60] sm:$0xff] %v1660_v31  ;;  %435 = vst [vmem:[#allocation2 + $0x68] sm:$0xff] %v1660_v31  ;;  %v1835_v44 = vld [vmem:[%s1820_s21 + $0x30] sm:$0xff]  ;;  %v461_v45 = vld [vmem:[%s1820_s21 + $0x38] sm:$0x3f]  ;;  %v791_v46 = vsub.s32 4, %v1809_v32  ;;  %v1843_v48 = vrot.slane %v1814_v33, %v639_v41 }
  0x37   : > { %436 = vst [vmem:[#allocation2 + $0x70] sm:$0xff] %v1660_v31  ;;  %437 = vst [vmem:[#allocation2 + $0x78] sm:$0xff] %v1660_v31  ;;  %v1840_v47 = vld [vmem:[%s1820_s21 + $0x40] sm:$0xff]  ;;  %v463_v49 = vld [vmem:[%s1820_s21 + $0x48] sm:$0x3f]  ;;  %v851_v50 = vsub.s32 7, %v1809_v32  ;;  %v1860_v54 = vrot.slane %v1814_v33, %v731_v43 }
  0x38   : > { %438 = vst [vmem:[#allocation2 + $0x80] sm:$0xff] %v1660_v31  ;;  %439 = vst [vmem:[#allocation2 + $0x88] sm:$0xff] %v1660_v31  ;;  %v1850_v51 = vld [vmem:[%s1820_s21 + $0x50] sm:$0xff]  ;;  %v1854_v52 = vmul.f32 0.0, %v1831_v42  ;;  %v1857_v53 = vmul.f32 0.0, %v1843_v48  ;;  %v1863_v55 = vrot.slane %v1814_v33, %v791_v46  ;;  %v466_v58 = vld [vmem:[%s1820_s21 + $0x60] sm:$0xff] }
  0x39   : > { %440 = vst [vmem:[#allocation2 + $0x90] sm:$0xff] %v1660_v31  ;;  %441 = vst [vmem:[#allocation2 + $0x98] sm:$0xff] %v1660_v31  ;;  %v1866_v56 = vrot.slane %v1814_v33, %v851_v50  ;;  %v465_v57 = vld [vmem:[%s1820_s21 + $0x58] sm:$0x3f]  ;;  %v467_v59 = vld [vmem:[%s1820_s21 + $0x68] sm:$0x3f]  ;;  %v1877_v63 = vmul.f32 %v1860_v54, %v466_v58  ;;  %v743_v19 = vmul.f32 %v1860_v54, %v1840_v47 }
  0x3a   : > { %442 = vst [vmem:[#allocation2 + $0xa0] sm:$0xff] %v1660_v31  ;;  %443 = vst [vmem:[#allocation2 + $0xa8] sm:$0xff] %v1660_v31  ;;  %v468_v60 = vld [vmem:[%s1820_s21 + $0x70] sm:$0xff]  ;;  %v469_v61 = vld [vmem:[%s1820_s21 + $0x78] sm:$0x3f]  ;;  %v1880_v0 = vmul.f32 %v1863_v55, %v466_v58  ;;  %v579_v6 = vsub.s32 3, %v1809_v32  ;;  %v803_v23 = vmul.f32 %v1863_v55, %v1850_v51 }
  0x3b   : > { %444 = vst [vmem:[#allocation2 + $0xb0] sm:$0xff] %v1660_v31  ;;  %445 = vst [vmem:[#allocation2 + $0xb8] sm:$0xff] %v1660_v31  ;;  %v1874_v62 = vld [vmem:[%s1820_s21 + $0x80] sm:$0xff]  ;;  %v863_v1 = vmul.f32 %v1866_v56, %v466_v58  ;;  %v471_v2 = vld [vmem:[%s1820_s21 + $0x88] sm:$0x3f]  ;;  %v1889_v4 = vmul.f32 %v1860_v54, %v468_v60  ;;  %v1892_v5 = vmul.f32 %v1863_v55, %v468_v60  ;;  %s417_s15 = scalar_select %p416_p10, %s1702_s18, 1 }
  0x3c   : > { %446 = vst [vmem:[#allocation2 + $0xc0] sm:$0xff] %v1660_v31  ;;  %447 = vst [vmem:[#allocation2 + $0xc8] sm:$0xff] %v1660_v31  ;;  %v1886_v3 = vld [vmem:[%s1820_s21 + $0x90] sm:$0xff]  ;;  %v473_v9 = vld [vmem:[%s1820_s21 + $0x98] sm:$0x3f]  ;;  %v1911_v14 = vrot.slane %v1814_v33, %v579_v6 }
  0x3d   : > { %448 = vst [vmem:[#allocation2 + $0xd0] sm:$0xff] %v1660_v31  ;;  %449 = vst [vmem:[#allocation2 + $0xd8] sm:$0xff] %v1660_v31  ;;  %v1902_v10 = vld [vmem:[%s1820_s21 + $0xa0] sm:$0xff]  ;;  %v475_v11 = vld [vmem:[%s1820_s21 + $0xa8] sm:$0x3f]  ;;  %s418_s26 = scalar_lea.vmem %s2845_s2, %s417_s15  ;;  %s421_s29 = scalar_lea.vmem %s2846_s3, %s417_s15 }
  0x3e   : > { %450 = vst [vmem:[#allocation2 + $0xe0] sm:$0xff] %v1660_v31  ;;  %451 = vst [vmem:[#allocation2 + $0xe8] sm:$0xff] %v1660_v31  ;;  %v1907_v12 = vld [vmem:[%s1820_s21 + $0xb0] sm:$0xff]  ;;  %v477_v13 = vld [vmem:[%s1820_s21 + $0xb8] sm:$0x3f] }
  0x3f   : > { %452 = vst [vmem:[#allocation2 + $0xf0] sm:$0xff] %v1660_v31  ;;  %453 = vst [vmem:[#allocation2 + $0xf8] sm:$0xff] %v1660_v31  ;;  %v1927_v28 = vld [vmem:[%s1820_s21 + $0xc0] sm:$0xff]  ;;  %v479_v29 = vld [vmem:[%s1820_s21 + $0xc8] sm:$0x3f] }
  0x40   : > { %2872 = vst [vmem:[#allocation6_spill] sm:$0xff] %v1817_v34  ;;  %483 = vst [vmem:[#allocation2 + $0x11] sm:$0xff] %v454_v35  ;;  %v1932_v31 = vld [vmem:[%s1820_s21 + $0xd0] sm:$0xff]  ;;  %v481_v35 = vld [vmem:[%s1820_s21 + $0xd8] sm:$0x3f] }
  0x41   : > { %484 = vst [vmem:[#allocation2 + $0x19] sm:$0x3f] %v455_v36  ;;  %485 = vst [vmem:[#allocation2 + $0x21] sm:$0xff] %v456_v37  ;;  %v943_v36 = vsub.s32 2, %v1809_v32  ;;  %v745_v37 = vmul.f32 %v1860_v54, %v1850_v51 }
  0x42   : > { %486 = vst [vmem:[#allocation2 + $0x29] sm:$0x3f] %v457_v38  ;;  %487 = vst [vmem:[#allocation2 + $0x31] sm:$0xff] %v458_v39  ;;  %v865_v39 = vmul.f32 %v1866_v56, %v468_v60 }
  0x43   : > { %488 = vst [vmem:[#allocation2 + $0x39] sm:$0x3f] %v459_v40  ;;  %2873 = vst [vmem:[#allocation7_spill] sm:$0xff] %v1835_v44 }
  0x44   : > { %2874 = vst [vmem:[#allocation8_spill] sm:$0xff] %v1840_v47  ;;  %489 = vst [vmem:[#allocation2 + $0x41] sm:$0xff] %v1835_v44 }
  0x45   : > { %490 = vst [vmem:[#allocation2 + $0x49] sm:$0x3f] %v461_v45  ;;  %491 = vst [vmem:[#allocation2 + $0x51] sm:$0xff] %v1840_v47  ;;  %v1003_v45 = vsub.s32 5, %v1809_v32 }
  0x46   : > { %2875 = vst [vmem:[#allocation9_spill] sm:$0xff] %v1850_v51  ;;  %492 = vst [vmem:[#allocation2 + $0x59] sm:$0x3f] %v463_v49  ;;  %v1947_v49 = vrot.slane %v1814_v33, %v943_v36  ;;  %v1992_v36 = vmul.f32 %v1863_v55, %v1886_v3 }
  0x47   : > { %493 = vst [vmem:[#allocation2 + $0x61] sm:$0xff] %v1850_v51  ;;  %494 = vst [vmem:[#allocation2 + $0x69] sm:$0x3f] %v465_v57 }
  0x48   : > { %495 = vst [vmem:[#allocation2 + $0x71] sm:$0xff] %v466_v58  ;;  %496 = vst [vmem:[#allocation2 + $0x79] sm:$0x3f] %v467_v59 }
  0x49   : > { %497 = vst [vmem:[#allocation2 + $0x81] sm:$0xff] %v468_v60  ;;  %498 = vst [vmem:[#allocation2 + $0x89] sm:$0x3f] %v469_v61  ;;  %v1952_v60 = vrot.slane %v1814_v33, %v1003_v45 }
  0x4a   : > { %499 = vst [vmem:[#allocation2 + $0x91] sm:$0xff] %v1874_v62  ;;  %500 = vst [vmem:[#allocation2 + $0x99] sm:$0x3f] %v471_v2 }
  0x4b   : > { %501 = vst [vmem:[#allocation2 + $0xa1] sm:$0xff] %v1886_v3  ;;  %502 = vst [vmem:[#allocation2 + $0xa9] sm:$0x3f] %v473_v9  ;;  %v1962_v9 = vmul.f32 %v1860_v54, %v1874_v62 }
  0x4c   : > { %v1896_v7 = vld [vmem:[#allocation2 + $0x50] sm:$0xff]  ;;  %503 = vst [vmem:[#allocation2 + $0xb1] sm:$0xff] %v1902_v10  ;;  %504 = vst [vmem:[#allocation2 + $0xb9] sm:$0x3f] %v475_v11  ;;  %v809_v11 = vmul.f32 %v1863_v55, %v1874_v62 }
  0x4d   : > { %v559_v15 = vmul.f32 %v1831_v42, %v1896_v7  ;;  %505 = vst [vmem:[#allocation2 + $0xc1] sm:$0xff] %v1907_v12  ;;  %506 = vst [vmem:[#allocation2 + $0xc9] sm:$0x3f] %v477_v13 }
  0x4e   : > { %v1898_v8 = vld [vmem:[#allocation2 + $0x60] sm:$0xff]  ;;  %507 = vst [vmem:[#allocation2 + $0xd1] sm:$0xff] %v1927_v28  ;;  %508 = vst [vmem:[#allocation2 + $0xd9] sm:$0x3f] %v479_v29 }
  0x4f   : > { %v591_v16 = vmul.f32 %v1911_v14, %v1898_v8  ;;  %v527_v17 = vld [vmem:[#allocation2 + $0x70] sm:$0xff]  ;;  %v561_v21 = vmul.f32 %v1831_v42, %v1898_v8  ;;  %509 = vst [vmem:[#allocation2 + $0xe1] sm:$0xff] %v1932_v31  ;;  %510 = vst [vmem:[#allocation2 + $0xe9] sm:$0x3f] %v481_v35  ;;  %v1949_v58 = vld [vmem:[#allocation2 + $0x62] sm:$0xff] }
  0x50   : > { %v651_v20 = vmul.f32 %v1843_v48, %v527_v17  ;;  %v593_v22 = vmul.f32 %v1911_v14, %v527_v17  ;;  %v529_v26 = vld [vmem:[#allocation2 + $0x80] sm:$0xff]  ;;  %v563_v40 = vmul.f32 %v1831_v42, %v527_v17  ;;  %2877 = vst [vmem:[#allocation11_spill] sm:$0xff] %v1949_v58  ;;  %v957_v61 = vmul.f32 %v1947_v49, %v1949_v58  ;;  %v1957_v2 = vld [vmem:[#allocation2 + $0x72] sm:$0xff] }
  0x51   : > { %v619_v18 = vadd.f32 %v591_v16, %v559_v15  ;;  %v653_v38 = vmul.f32 %v1843_v48, %v529_v26  ;;  %v595_v43 = vmul.f32 %v1911_v14, %v529_v26  ;;  %v531_v57 = vld [vmem:[#allocation2 + $0x90] sm:$0xff]  ;;  %v925_v32 = vld [vmem:[#allocation2 + $0x82] sm:$0xff]  ;;  %v1017_v33 = vmul.f32 %v1952_v60, %v1957_v2 }
  0x52   : > { %v621_v27 = vadd.f32 %v593_v22, %v561_v21  ;;  %v655_v6 = vmul.f32 %v1843_v48, %v531_v57  ;;  %v867_v15 = vmul.f32 %v1866_v56, %v1874_v62  ;;  %v565_v17 = vmul.f32 %v1831_v42, %v529_v26  ;;  %v1982_v29 = vld [vmem:[#allocation2 + $0x92] sm:$0xff] }
  0x53   : > { %v679_v24 = vadd.f32 %v651_v20, %v619_v18  ;;  %v623_v59 = vadd.f32 %v595_v43, %v563_v40  ;;  %v597_v20 = vmul.f32 %v1911_v14, %v531_v57  ;;  %v1019_v26 = vmul.f32 %v1952_v60, %v925_v32  ;;  %v514_v40 = vld [vmem:[#allocation2 + $0x8] sm:$0x3f]  ;;  %v544_v43 = vld [vmem:[#allocation2 + $0xf8] sm:$0x3f] }
  0x54   : > { %v681_v46 = vadd.f32 %v653_v38, %v621_v27  ;;  %v869_v38 = vmul.f32 %v1866_v56, %v1886_v3  ;;  %v567_v45 = vmul.f32 %v1831_v42, %v531_v57  ;;  %v961_v57 = vmul.f32 %v1947_v49, %v925_v32 }
  0x55   : > { %v771_v25 = vadd.f32 %v743_v19, %v679_v24  ;;  %v683_v16 = vadd.f32 %v655_v6, %v623_v59  ;;  %v625_v27 = vadd.f32 %v597_v20, %v565_v17  ;;  %v727_v59 = vld [vmem:[#allocation2 + $0xf1] sm:$0xff] }
  0x56   : > { %v773_v50 = vadd.f32 %v745_v37, %v681_v46  ;;  %v2018_v20 = vmul.f32 %v1866_v56, %v727_v59  ;;  %v2052_v59 = vld [vmem:[#allocation2 + $0x49] sm:$0x3f] }
  0x57   : > { %v831_v30 = vadd.f32 %v803_v23, %v771_v25  ;;  %v775_v21 = vadd.f32 %v1877_v63, %v683_v16  ;;  %v959_v23 = vmul.f32 %v1947_v49, %v1957_v2  ;;  %v533_v25 = vld [vmem:[#allocation2 + $0xa0] sm:$0xff]  ;;  %v1988_v63 = vmul.f32 %v1860_v54, %v1886_v3  ;;  %v2006_v3 = vld [vmem:[#allocation2 + $0x28] sm:$0x3f]  ;;  %2883 = vst [vmem:[#allocation17_spill] sm:$0xff] %v2052_v59 }
  0x58   : > { %v657_v35 = vmul.f32 %v1843_v48, %v533_v25  ;;  %v2009_v16 = vmul.f32 %v1843_v48, %v544_v43 }
  0x59   : > { %v1942_v41 = vadd.f32 %v863_v1, %v831_v30  ;;  %v833_v1 = vadd.f32 %v1880_v0, %v773_v50  ;;  %v1971_v0 = vld [vmem:[%s1811_s20 + $0x8] ss:$0 sm:$0xff]  ;;  %v835_v24 = vadd.f32 %v1892_v5, %v775_v21  ;;  %v599_v50 = vmul.f32 %v1911_v14, %v533_v25 }
  0x5a   : > { %v1077_v19 = vmul.f32 %v1971_v0, %v925_v32  ;;  %v1079_v37 = vmul.f32 %v1971_v0, %v1982_v29  ;;  %2880 = vst [vmem:[#allocation14_spill] sm:$0xff] %v2009_v16 }
  0x5b   : > { %2876 = vst [vmem:[#allocation10_spill] sm:$0xff] %v1942_v41  ;;  %v893_v13 = vadd.f32 %v865_v39, %v833_v1  ;;  %v895_v30 = vadd.f32 %v867_v15, %v835_v24  ;;  %v685_v39 = vadd.f32 %v657_v35, %v625_v27  ;;  %v939_v1 = vld [vmem:[#allocation2 + $0xf2] sm:$0xff]  ;;  %v2004_v15 = vmul.f32 %v1831_v42, %v514_v40 }
  0x5c   : > { %v1021_v27 = vmul.f32 %v1952_v60, %v1982_v29 }
  0x5d   : > { %v985_v18 = vadd.f32 %v957_v61, %v893_v13  ;;  %v987_v5 = vadd.f32 %v959_v23, %v895_v30  ;;  %v728_v61 = vld [vmem:[#allocation2 + $0xf9] sm:$0x3f]  ;;  %v777_v6 = vadd.f32 %v1889_v4, %v685_v39  ;;  %v2023_v23 = vld [vmem:[#allocation2 + $0xa2] sm:$0xff]  ;;  %v584_v30 = vmul.f32 %v1911_v14, %v2006_v3 }
  0x5e   : > { %v520_v4 = vld [vmem:[#allocation2 + $0x38] sm:$0x3f]  ;;  %v2021_v21 = vmul.f32 %v1866_v56, %v728_v61  ;;  %v554_v39 = vmul.f32 %v1831_v42, %v2006_v3 }
  0x5f   : > { %v1045_v22 = vadd.f32 %v1017_v33, %v985_v18  ;;  %v1047_v46 = vadd.f32 %v1019_v26, %v987_v5  ;;  %v516_v33 = vld [vmem:[#allocation2 + $0x18] sm:$0x3f]  ;;  %v837_v17 = vadd.f32 %v809_v11, %v777_v6  ;;  %v2012_v18 = vld [vmem:[#allocation2 + $0xb0] sm:$0xff]  ;;  %v522_v11 = vld [vmem:[#allocation2 + $0x48] sm:$0x3f]  ;;  %v2037_v5 = vmul.f32 %v1860_v54, %v1902_v10 }
  0x60   : > { %2881 = vst [vmem:[#allocation15_spill] sm:$0xff] %v2021_v21  ;;  %v552_v24 = vmul.f32 %v1831_v42, %v516_v33  ;;  %v2027_v32 = vmul.f32 %v1911_v14, %v516_v33  ;;  %v659_v35 = vmul.f32 %v1843_v48, %v2012_v18  ;;  %v586_v40 = vmul.f32 %v1911_v14, %v520_v4 }
  0x61   : > { %v1980_v62 = vadd.f32 %v1077_v19, %v1045_v22  ;;  %v2001_v13 = vadd.f32 %v1079_v37, %v1047_v46  ;;  %v2015_v19 = vmul.f32 %v1971_v0, %v939_v1  ;;  %v627_v22 = vadd.f32 %v599_v50, %v567_v45 }
  0x62   : > { %v897_v26 = vadd.f32 %v869_v38, %v837_v17  ;;  %v2041_v37 = vmul.f32 %v1863_v55, %v1902_v10  ;;  %v2046_v38 = vld [vmem:[#allocation2 + $0x39] sm:$0x3f]  ;;  %v1081_v45 = vmul.f32 %v1971_v0, %v2023_v23  ;;  %v556_v46 = vmul.f32 %v1831_v42, %v520_v4 }
  0x63   : > { %2878 = vst [vmem:[#allocation12_spill] sm:$0xff] %v1980_v62  ;;  %2879 = vst [vmem:[#allocation13_spill] sm:$0xff] %v2001_v13  ;;  %v588_v50 = vmul.f32 %v1911_v14, %v522_v11  ;;  %v687_v61 = vadd.f32 %v659_v35, %v627_v22  ;;  %v871_v1 = vmul.f32 %v1866_v56, %v1902_v10  ;;  %v526_v13 = vld [vmem:[#allocation2 + $0x68] sm:$0x3f] }
  0x64   : > { %2882 = vst [vmem:[#allocation16_spill] sm:$0xff] %v2046_v38  ;;  %v989_v43 = vadd.f32 %v961_v57, %v897_v26  ;;  %v2057_v6 = vmul.f32 %v1843_v48, %v520_v4  ;;  %v569_v33 = vmul.f32 %v1831_v42, %v533_v25  ;;  %v601_v57 = vmul.f32 %v1911_v14, %v2012_v18  ;;  %v2097_v62 = vld [vmem:[#allocation2 + $0x88] sm:$0x3f] }
  0x65   : > { %v2062_v26 = vadd.f32 %v584_v30, %v552_v24  ;;  %v2066_v34 = vmul.f32 %v1860_v54, %v2046_v38  ;;  %v558_v22 = vmul.f32 %v1831_v42, %v522_v11  ;;  %v779_v35 = vadd.f32 %v1962_v9, %v687_v61  ;;  %v708_v24 = vld [vmem:[#allocation2 + $0x59] sm:$0x3f] }
  0x66   : > { %2884 = vst [vmem:[#allocation18_spill] sm:$0xff] %v2057_v6  ;;  %v1049_v17 = vadd.f32 %v1021_v27, %v989_v43  ;;  %v2070_v10 = vadd.f32 %v586_v40, %v554_v39  ;;  %v2073_v4 = vmul.f32 %v1843_v48, %v522_v11  ;;  %v2077_v25 = vmul.f32 %v1860_v54, %v2052_v59  ;;  %v524_v27 = vld [vmem:[#allocation2 + $0x58] sm:$0x3f]  ;;  %v2088_v40 = vld [vmem:[#allocation2 + $0xc0] sm:$0xff] }
  0x67   : > { %2885 = vst [vmem:[#allocation19_spill] sm:$0xff] %v2062_v26  ;;  %2886 = vst [vmem:[#allocation20_spill] sm:$0xff] %v2066_v34  ;;  %v616_v43 = vadd.f32 %v588_v50, %v556_v46  ;;  %v2083_v21 = vmul.f32 %v1863_v55, %v2052_v59  ;;  %v528_v9 = vld [vmem:[#allocation2 + $0x78] sm:$0x3f]  ;;  %v963_v39 = vmul.f32 %v1947_v49, %v1982_v29 }
  0x68   : > { %2887 = vst [vmem:[#allocation21_spill] sm:$0xff] %v2070_v10  ;;  %2888 = vst [vmem:[#allocation22_spill] sm:$0xff] %v2073_v4  ;;  %v2079_v30 = vadd.f32 %v1081_v45, %v1049_v17  ;;  %v839_v11 = vadd.f32 %v1992_v36, %v779_v35  ;;  %v560_v61 = vmul.f32 %v1831_v42, %v524_v27  ;;  %v2093_v50 = vld [vmem:[#allocation2 + $0xb2] sm:$0xff] }
  0x69   : > { %2890 = vst [vmem:[#allocation24_spill] sm:$0xff] %v2083_v21  ;;  %v562_v16 = vmul.f32 %v1831_v42, %v526_v13  ;;  %v594_v45 = vmul.f32 %v1911_v14, %v528_v9  ;;  %v629_v46 = vadd.f32 %v601_v57, %v569_v33  ;;  %v590_v17 = vmul.f32 %v1911_v14, %v524_v27 }
  0x6a   : > { %2889 = vst [vmem:[#allocation23_spill] sm:$0xff] %v2079_v30  ;;  %v648_v30 = vmul.f32 %v1843_v48, %v524_v27  ;;  %v1023_v29 = vmul.f32 %v1952_v60, %v2023_v23  ;;  %v899_v36 = vadd.f32 %v871_v1, %v839_v11  ;;  %v744_v35 = vmul.f32 %v1860_v54, %v708_v24 }
  0x6b   : > { %v2103_v41 = vmul.f32 %v1863_v55, %v708_v24  ;;  %v592_v51 = vmul.f32 %v1911_v14, %v526_v13  ;;  %v661_v33 = vmul.f32 %v1843_v48, %v2088_v40  ;;  %v2109_v57 = vmul.f32 %v1866_v56, %v708_v24 }
  0x6c   : > { %v991_v27 = vadd.f32 %v963_v39, %v899_v36  ;;  %v1083_v21 = vmul.f32 %v1971_v0, %v2093_v50  ;;  %v2115_v1 = vmul.f32 %v1860_v54, %v1907_v12  ;;  %v622_v11 = vadd.f32 %v594_v45, %v562_v16 }
  0x6d   : > { %2891 = vst [vmem:[#allocation25_spill] sm:$0xff] %v2109_v57  ;;  %v654_v59 = vmul.f32 %v1843_v48, %v2097_v62  ;;  %v689_v47 = vadd.f32 %v661_v33, %v629_v46  ;;  %v2121_v34 = vmul.f32 %v1863_v55, %v1907_v12  ;;  %v618_v38 = vadd.f32 %v590_v17, %v558_v22  ;;  %v2126_v57 = vld [vmem:[#allocation2 + $0x5a] sm:$0x3f]  ;;  %v710_v33 = vld [vmem:[#allocation2 + $0x69] sm:$0x3f] }
  0x6e   : > { %v650_v24 = vmul.f32 %v1843_v48, %v526_v13  ;;  %v1051_v39 = vadd.f32 %v1023_v29, %v991_v27  ;;  %v873_v36 = vmul.f32 %v1866_v56, %v1907_v12  ;;  %2892 = vst [vmem:[#allocation26_spill] sm:$0xff] %v2126_v57  ;;  %v620_v44 = vadd.f32 %v592_v51, %v560_v61  ;;  %v2133_v22 = vld [vmem:[#allocation2 + $0x98] sm:$0x3f]  ;;  %v2155_v27 = vld [vmem:[#allocation2 + $0xc2] sm:$0xff] }
  0x6f   : > { %v564_v16 = vmul.f32 %v1831_v42, %v528_v9  ;;  %v596_v45 = vmul.f32 %v1911_v14, %v2097_v62  ;;  %v781_v46 = vadd.f32 %v1988_v63, %v689_v47  ;;  %v652_v4 = vmul.f32 %v1843_v48, %v528_v9 }
  0x70   : > { %v571_v13 = vmul.f32 %v1831_v42, %v2012_v18  ;;  %v2137_v17 = vadd.f32 %v1083_v21, %v1051_v39  ;;  %v603_v51 = vmul.f32 %v1911_v14, %v2088_v40  ;;  %v746_v12 = vmul.f32 %v1860_v54, %v710_v33 }
  0x71   : > { %v682_v61 = vadd.f32 %v654_v59, %v622_v11  ;;  %v965_v29 = vmul.f32 %v1947_v49, %v2023_v23  ;;  %v841_v47 = vadd.f32 %v2041_v37, %v781_v46  ;;  %v2145_v63 = vadd.f32 %v648_v30, %v616_v43  ;;  %v539_v30 = vld [vmem:[#allocation2 + $0xd0] sm:$0xff] }
  0x72   : > { %2893 = vst [vmem:[#allocation27_spill] sm:$0xff] %v2137_v17  ;;  %v2149_v9 = vmul.f32 %v1947_v49, %v2126_v57  ;;  %v2153_v18 = vmul.f32 %v1952_v60, %v2126_v57  ;;  %v678_v21 = vadd.f32 %v650_v24, %v618_v38  ;;  %v624_v39 = vadd.f32 %v596_v45, %v564_v16  ;;  %v712_v17 = vld [vmem:[#allocation2 + $0x79] sm:$0x3f] }
  0x73   : > { %2894 = vst [vmem:[#allocation28_spill] sm:$0xff] %v2145_v63  ;;  %v656_v59 = vmul.f32 %v1843_v48, %v2133_v22  ;;  %v1025_v23 = vmul.f32 %v1952_v60, %v2093_v50  ;;  %v901_v37 = vadd.f32 %v873_v36, %v841_v47  ;;  %v804_v43 = vmul.f32 %v1863_v55, %v710_v33  ;;  %v2169_v63 = vld [vmem:[#allocation2 + $0x89] sm:$0x3f] }
  0x74   : > { %2895 = vst [vmem:[#allocation29_spill] sm:$0xff] %v2153_v18  ;;  %v2163_v11 = vmul.f32 %v1866_v56, %v710_v33  ;;  %v680_v46 = vadd.f32 %v652_v4, %v620_v44  ;;  %v631_v18 = vadd.f32 %v603_v51, %v571_v13  ;;  %v806_v38 = vmul.f32 %v1863_v55, %v712_v17  ;;  %v922_v4 = vld [vmem:[#allocation2 + $0x6a] sm:$0x3f] }
  0x75   : > { %v774_v24 = vadd.f32 %v746_v12, %v682_v61  ;;  %v993_v16 = vadd.f32 %v965_v29, %v901_v37  ;;  %v1085_v45 = vmul.f32 %v1971_v0, %v2155_v27  ;;  %v770_v57 = vadd.f32 %v2077_v25, %v678_v21 }
  0x76   : > { %v663_v36 = vmul.f32 %v1843_v48, %v539_v30  ;;  %v2174_v33 = vmul.f32 %v1860_v54, %v1927_v28  ;;  %v2178_v44 = vmul.f32 %v1863_v55, %v1927_v28  ;;  %v748_v13 = vmul.f32 %v1860_v54, %v712_v17 }
  0x77   : > { %v684_v51 = vadd.f32 %v656_v59, %v624_v39  ;;  %v1053_v12 = vadd.f32 %v1025_v23, %v993_v16  ;;  %v875_v25 = vmul.f32 %v1866_v56, %v1927_v28  ;;  %v772_v61 = vadd.f32 %v744_v35, %v680_v46  ;;  %v2202_v16 = vld [vmem:[#allocation2 + $0x99] sm:$0x3f] }
  0x78   : > { %v573_v29 = vmul.f32 %v1831_v42, %v2088_v40  ;;  %v605_v47 = vmul.f32 %v1911_v14, %v539_v30  ;;  %v691_v21 = vadd.f32 %v663_v36, %v631_v18  ;;  %v958_v37 = vmul.f32 %v1947_v49, %v922_v4 }
  0x79   : > { %v834_v10 = vadd.f32 %v806_v38, %v774_v24  ;;  %v866_v6 = vmul.f32 %v1866_v56, %v2169_v63  ;;  %v2189_v26 = vadd.f32 %v1085_v45, %v1053_v12  ;;  %v830_v39 = vadd.f32 %v2103_v41, %v770_v57  ;;  %v541_v38 = vld [vmem:[#allocation2 + $0xe0] sm:$0xff] }
  0x7a   : > { %v2194_v28 = vmul.f32 %v1952_v60, %v1949_v58  ;;  %v1016_v35 = vmul.f32 %v1952_v60, %v922_v4  ;;  %v783_v40 = vadd.f32 %v2037_v5, %v691_v21  ;;  %v864_v18 = vmul.f32 %v1866_v56, %v712_v17 }
  0x7b   : > { %2896 = vst [vmem:[#allocation30_spill] sm:$0xff] %v2189_v26  ;;  %v808_v59 = vmul.f32 %v1863_v55, %v2169_v63  ;;  %v776_v23 = vadd.f32 %v748_v13, %v684_v51  ;;  %v575_v46 = vmul.f32 %v1831_v42, %v539_v30  ;;  %v832_v24 = vadd.f32 %v804_v43, %v772_v61  ;;  %v935_v13 = vld [vmem:[#allocation2 + $0xd2] sm:$0xff]  ;;  %v926_v26 = vld [vmem:[#allocation2 + $0x8a] sm:$0x3f] }
  0x7c   : > { %v967_v41 = vmul.f32 %v1947_v49, %v2093_v50  ;;  %v633_v57 = vadd.f32 %v605_v47, %v573_v29  ;;  %v843_v45 = vadd.f32 %v2121_v34, %v783_v40  ;;  %v566_v5 = vmul.f32 %v1831_v42, %v2097_v62  ;;  %v924_v47 = vld [vmem:[#allocation2 + $0x7a] sm:$0x3f] }
  0x7d   : > { %v894_v17 = vadd.f32 %v866_v6, %v834_v10  ;;  %v598_v36 = vmul.f32 %v1911_v14, %v2133_v22  ;;  %v607_v30 = vmul.f32 %v1911_v14, %v541_v38  ;;  %v1027_v43 = vmul.f32 %v1952_v60, %v2155_v27  ;;  %v2219_v6 = vld [vmem:[#allocation2 + $0xa8] sm:$0x3f] }
  0x7e   : > { %v903_v51 = vadd.f32 %v875_v25, %v843_v45  ;;  %v665_v12 = vmul.f32 %v1843_v48, %v541_v38  ;;  %v819_v50 = vmul.f32 %v1863_v55, %v1932_v31  ;;  %v836_v34 = vadd.f32 %v808_v59, %v776_v23 }
  0x7f   : > { %v868_v62 = vmul.f32 %v1866_v56, %v2202_v16  ;;  %v635_v10 = vadd.f32 %v607_v30, %v575_v46  ;;  %v877_v61 = vmul.f32 %v1866_v56, %v1932_v31  ;;  %v892_v29 = vadd.f32 %v864_v18, %v832_v24 }
  0x80   : > { %v995_v21 = vadd.f32 %v967_v41, %v903_v51  ;;  %v1087_v25 = vmul.f32 %v1971_v0, %v935_v13  ;;  %v693_v40 = vadd.f32 %v665_v12, %v633_v57  ;;  %v2225_v38 = vmul.f32 %v1971_v0, %v922_v4 }
  0x81   : > { %v1018_v59 = vmul.f32 %v1952_v60, %v924_v47  ;;  %v986_v23 = vadd.f32 %v958_v37, %v894_v17  ;;  %v695_v45 = vadd.f32 %v1857_v53, %v635_v10  ;;  %v626_v58 = vadd.f32 %v598_v36, %v566_v5  ;;  %v937_v36 = vld [vmem:[#allocation2 + $0xe2] sm:$0xff] }
  0x82   : > { %v658_v46 = vmul.f32 %v1843_v48, %v2219_v6  ;;  %v1055_v31 = vadd.f32 %v1027_v43, %v995_v21  ;;  %v785_v18 = vadd.f32 %v2115_v1, %v693_v40  ;;  %v2233_v24 = vadd.f32 %v2163_v11, %v830_v39 }
  0x83   : > { %v960_v41 = vmul.f32 %v1947_v49, %v924_v47  ;;  %v2238_v4 = vmul.f32 %v1971_v0, %v1957_v2  ;;  %v896_v37 = vadd.f32 %v868_v62, %v836_v34  ;;  %v984_v53 = vadd.f32 %v2149_v9, %v892_v29  ;;  %v515_v62 = vld [vmem:[#allocation2 + $0x10] sm:$0xff] }
  0x84   : > { %v969_v57 = vmul.f32 %v1947_v49, %v2155_v27  ;;  %v2243_v5 = vadd.f32 %v1087_v25, %v1055_v31  ;;  %v845_v17 = vadd.f32 %v2178_v44, %v785_v18  ;;  %v1076_v1 = vmul.f32 %v1971_v0, %v924_v47  ;;  %v928_v47 = vld [vmem:[#allocation2 + $0x9a] sm:$0x3f] }
  0x85   : > { %v1046_v11 = vadd.f32 %v1018_v59, %v986_v23  ;;  %v1078_v39 = vmul.f32 %v1971_v0, %v926_v26  ;;  %v787_v30 = vadd.f32 %v2174_v33, %v695_v45  ;;  %v750_v2 = vmul.f32 %v1860_v54, %v2169_v63  ;;  %v718_v45 = vld [vmem:[#allocation2 + $0xa9] sm:$0x3f] }
  0x86   : > { %2897 = vst [vmem:[#allocation31_spill] sm:$0xff] %v2243_v5  ;;  %v686_v43 = vadd.f32 %v658_v46, %v626_v58  ;;  %v1029_v9 = vmul.f32 %v1952_v60, %v935_v13  ;;  %v905_v51 = vadd.f32 %v877_v61, %v845_v17  ;;  %v1020_v27 = vmul.f32 %v1952_v60, %v926_v26  ;;  %v517_v17 = vld [vmem:[#allocation2 + $0x20] sm:$0xff]  ;;  %v702_v5 = vld [vmem:[#allocation2 + $0x29] sm:$0x3f] }
  0x87   : > { %v988_v12 = vadd.f32 %v960_v41, %v896_v37  ;;  %v971_v44 = vmul.f32 %v1947_v49, %v935_v13  ;;  %v847_v34 = vadd.f32 %v819_v50, %v787_v30  ;;  %v1044_v10 = vadd.f32 %v1016_v35, %v984_v53 }
  0x88   : > { %v2255_v29 = vmul.f32 %v1947_v49, %v926_v26  ;;  %v997_v33 = vadd.f32 %v969_v57, %v905_v51  ;;  %v1089_v21 = vmul.f32 %v1971_v0, %v937_v36  ;;  %v2258_v63 = vadd.f32 %v1078_v39, %v1046_v11  ;;  %v930_v39 = vld [vmem:[#allocation2 + $0xaa] sm:$0x3f]  ;;  %v521_v51 = vld [vmem:[#allocation2 + $0x40] sm:$0xff] }
  0x89   : > { %v568_v58 = vmul.f32 %v1831_v42, %v2133_v22  ;;  %v1031_v61 = vmul.f32 %v1952_v60, %v937_v36  ;;  %v907_v25 = vadd.f32 %v2018_v20, %v847_v34  ;;  %v810_v13 = vmul.f32 %v1863_v55, %v2202_v16  ;;  %v519_v36 = vld [vmem:[#allocation2 + $0x30] sm:$0xff] }
  0x8a   : > { %v778_v35 = vadd.f32 %v750_v2, %v686_v43  ;;  %v1057_v26 = vadd.f32 %v1029_v9, %v997_v33  ;;  %v581_v50 = vmul.f32 %v1911_v14, %v515_v62  ;;  %v1048_v40 = vadd.f32 %v1020_v27, %v988_v12 }
  0x8b   : > { %v1080_v59 = vmul.f32 %v1971_v0, %v928_v47  ;;  %v600_v23 = vmul.f32 %v1911_v14, %v2219_v6  ;;  %v999_v22 = vadd.f32 %v971_v44, %v907_v25  ;;  %v2270_v46 = vadd.f32 %v1076_v1, %v1044_v10  ;;  %v697_v25 = vld [vmem:[#allocation2 + $0x1] sm:$0xff] }
  0x8c   : > { %v2274_v20 = vmul.f32 %v1860_v54, %v2202_v16  ;;  %v2276_v31 = vadd.f32 %v1089_v21, %v1057_v26  ;;  %v609_v18 = vadd.f32 %v581_v50, %v1854_v52  ;;  %v2281_v41 = vmul.f32 %v2258_v63, %v2258_v63  ;;  %v536_v21 = vld [vmem:[#allocation2 + $0xb8] sm:$0x3f] }
  0x8d   : > { %v2284_v37 = vmul.f32 %v1947_v49, %v928_v47  ;;  %v2287_v53 = vmul.f32 %v1952_v60, %v928_v47  ;;  %v1059_v57 = vadd.f32 %v1031_v61, %v999_v22  ;;  %v570_v16 = vmul.f32 %v1831_v42, %v2219_v6 }
  0x8e   : > { %2898 = vst [vmem:[#allocation32_spill] sm:$0xff] %v2276_v31  ;;  %2899 = vst [vmem:[#allocation33_spill] sm:$0xff] %v2281_v41  ;;  %v2292_v1 = vmul.f32 %v1860_v54, %v718_v45  ;;  %v838_v11 = vadd.f32 %v810_v13, %v778_v35  ;;  %v870_v52 = vmul.f32 %v1866_v56, %v718_v45 }
  0x8f   : > { %v2295_v30 = vadd.f32 %v1080_v59, %v1048_v40  ;;  %v628_v2 = vadd.f32 %v600_v23, %v568_v58  ;;  %v2298_v43 = vmul.f32 %v1863_v55, %v718_v45  ;;  %v2301_v9 = vadd.f32 %v2015_v19, %v1059_v57 }
  0x90   : > { %v2304_v6 = vmul.f32 %v1947_v49, %v930_v39  ;;  %v551_v27 = vmul.f32 %v1831_v42, %v515_v62  ;;  %v583_v12 = vmul.f32 %v1911_v14, %v517_v17  ;;  %v641_v44 = vmul.f32 %v1843_v48, %v517_v17 }
  0x91   : > { %2900 = vst [vmem:[#allocation34_spill] sm:$0xff] %v2295_v30  ;;  %2901 = vst [vmem:[#allocation35_spill] sm:$0xff] %v2301_v9  ;;  %v2310_v34 = vmul.f32 %v1952_v60, %v930_v39  ;;  %v2313_v10 = vmul.f32 %v1971_v0, %v930_v39  ;;  %v553_v47 = vmul.f32 %v1831_v42, %v517_v17  ;;  %v2321_v13 = vsel %vm1121_vm0, %v2295_v30, 0.0  ;;  %v698_v39 = vld [vmem:[#allocation2 + $0x9] sm:$0x3f]  ;;  %v2910_v30 = vld [vmem:[#allocation16_spill] sm:$0xff] }
  0x92   : > { %2902 = vst [vmem:[#allocation36_spill] sm:$0xff] %v2304_v6  ;;  %v585_v19 = vmul.f32 %v1911_v14, %v519_v36  ;;  %v898_v33 = vadd.f32 %v870_v52, %v838_v11  ;;  %v555_v58 = vmul.f32 %v1831_v42, %v519_v36  ;;  %v587_v62 = vmul.f32 %v1911_v14, %v521_v51 }
  0x93   : > { %2903 = vst [vmem:[#allocation37_spill] sm:$0xff] %v2310_v34  ;;  %v669_v61 = vadd.f32 %v641_v44, %v609_v18  ;;  %2904 = vst [vmem:[#allocation38_spill] sm:$0xff] %v2321_v13  ;;  %v602_v35 = vmul.f32 %v1911_v14, %v536_v21  ;;  %v610_v26 = vadd.f32 %v2027_v32, %v2004_v15  ;;  %v720_v32 = vld [vmem:[#allocation2 + $0xb9] sm:$0x3f] }
  0x94   : > { %v642_v50 = vmul.f32 %v1843_v48, %v2006_v3  ;;  %v557_v40 = vmul.f32 %v1831_v42, %v521_v51  ;;  %v589_v59 = vmul.f32 %v1911_v14, %v1896_v7  ;;  %v611_v23 = vadd.f32 %v583_v12, %v551_v27  ;;  %v699_v27 = vld [vmem:[#allocation2 + $0x11] sm:$0xff]  ;;  %v700_v44 = vld [vmem:[#allocation2 + $0x19] sm:$0x3f] }
  0x95   : > { %v643_v45 = vmul.f32 %v1843_v48, %v519_v36  ;;  %v2333_v22 = vmul.f32 %v1831_v42, %v536_v21  ;;  %v613_v18 = vadd.f32 %v585_v19, %v553_v47  ;;  %v645_v57 = vmul.f32 %v1843_v48, %v521_v51 }
  0x96   : > { %v733_v17 = vmul.f32 %v1860_v54, %v697_v25  ;;  %v990_v15 = vadd.f32 %v2255_v29, %v898_v33  ;;  %v660_v3 = vmul.f32 %v1843_v48, %v536_v21  ;;  %v615_v11 = vadd.f32 %v587_v62, %v555_v58  ;;  %v701_v58 = vld [vmem:[#allocation2 + $0x21] sm:$0xff] }
  0x97   : > { %v647_v52 = vmul.f32 %v1843_v48, %v1896_v7  ;;  %v2342_v36 = vmul.f32 %v1860_v54, %v720_v32  ;;  %v2345_v12 = vmul.f32 %v1863_v55, %v720_v32  ;;  %v670_v51 = vadd.f32 %v642_v50, %v610_v26  ;;  %v703_v7 = vld [vmem:[#allocation2 + $0x31] sm:$0xff]  ;;  %v2905_v62 = vld [vmem:[#allocation19_spill] sm:$0xff]  ;;  %v2906_v25 = vld [vmem:[#allocation18_spill] sm:$0xff] }
  0x98   : > { %v761_v47 = vadd.f32 %v733_v17, %v669_v61  ;;  %v2347_v19 = vadd.f32 %v602_v35, %v570_v16  ;;  %v617_v29 = vadd.f32 %v589_v59, %v557_v40  ;;  %v649_v33 = vmul.f32 %v1843_v48, %v1898_v8  ;;  %v2907_v50 = vld [vmem:[#allocation21_spill] sm:$0xff]  ;;  %v2908_v61 = vld [vmem:[#allocation22_spill] sm:$0xff] }
  0x99   : > { %v671_v21 = vadd.f32 %v643_v45, %v611_v23  ;;  %v672_v9 = vadd.f32 %v2906_v25, %v2905_v62  ;;  %v673_v31 = vadd.f32 %v645_v57, %v613_v18  ;;  %v734_v41 = vmul.f32 %v1860_v54, %v698_v39  ;;  %v2909_v62 = vld [vmem:[#allocation7_spill] sm:$0xff] }
  0x9a   : > { %v793_v26 = vmul.f32 %v1863_v55, %v699_v27  ;;  %v674_v16 = vadd.f32 %v2908_v61, %v2907_v50  ;;  %v675_v35 = vadd.f32 %v647_v52, %v615_v11  ;;  %v735_v40 = vmul.f32 %v1860_v54, %v699_v27 }
  0x9b   : > { %v736_v8 = vmul.f32 %v1860_v54, %v700_v44  ;;  %v737_v59 = vmul.f32 %v1860_v54, %v701_v58  ;;  %v739_v23 = vmul.f32 %v1860_v54, %v703_v7  ;;  %v762_v45 = vadd.f32 %v734_v41, %v670_v51 }
  0x9c   : > { %v821_v17 = vadd.f32 %v793_v26, %v761_v47  ;;  %v688_v18 = vadd.f32 %v660_v3, %v628_v2  ;;  %v677_v57 = vadd.f32 %v649_v33, %v617_v29  ;;  %v738_v39 = vmul.f32 %v1860_v54, %v702_v5  ;;  %v909_v33 = vld [vmem:[#allocation2 + $0x2] sm:$0xff]  ;;  %v2912_v26 = vld [vmem:[#allocation20_spill] sm:$0xff] }
  0x9d   : > { %v741_v25 = vmul.f32 %v1860_v54, %v2909_v62  ;;  %v763_v13 = vadd.f32 %v735_v40, %v671_v21  ;;  %v764_v50 = vadd.f32 %v736_v8, %v672_v9  ;;  %v765_v11 = vadd.f32 %v737_v59, %v673_v31  ;;  %v2911_v21 = vld [vmem:[#allocation28_spill] sm:$0xff] }
  0x9e   : > { %v794_v52 = vmul.f32 %v1863_v55, %v700_v44  ;;  %v766_v27 = vadd.f32 %v738_v39, %v674_v16  ;;  %v797_v61 = vmul.f32 %v1863_v55, %v703_v7  ;;  %v798_v6 = vmul.f32 %v1863_v55, %v2910_v30  ;;  %v2382_v59 = vld [vmem:[#allocation2 + $0x52] sm:$0xff]  ;;  %v910_v39 = vld [vmem:[#allocation2 + $0xa] sm:$0x3f] }
  0x9f   : > { %v853_v41 = vmul.f32 %v1866_v56, %v701_v58  ;;  %v767_v2 = vadd.f32 %v739_v23, %v675_v35  ;;  %v796_v3 = vmul.f32 %v1863_v55, %v702_v5  ;;  %v799_v51 = vmul.f32 %v1863_v55, %v2909_v62  ;;  %v2913_v23 = vld [vmem:[#allocation8_spill] sm:$0xff] }
  0xa0   : > { %v822_v47 = vadd.f32 %v794_v52, %v762_v45  ;;  %v2373_v9 = vadd.f32 %v2287_v53, %v990_v15  ;;  %v2376_v31 = vmul.f32 %v1866_v56, %v720_v32  ;;  %v795_v44 = vmul.f32 %v1863_v55, %v701_v58 }
  0xa1   : > { %v881_v29 = vadd.f32 %v853_v41, %v821_v17  ;;  %v768_v16 = vadd.f32 %v2912_v26, %v2911_v21  ;;  %v769_v35 = vadd.f32 %v741_v25, %v677_v57  ;;  %v824_v40 = vadd.f32 %v796_v3, %v764_v50  ;;  %v2914_v25 = vld [vmem:[#allocation17_spill] sm:$0xff] }
  0xa2   : > { %v854_v8 = vmul.f32 %v1866_v56, %v702_v5  ;;  %v801_v53 = vmul.f32 %v1863_v55, %v2913_v23  ;;  %v823_v15 = vadd.f32 %v795_v44, %v763_v13  ;;  %v825_v45 = vadd.f32 %v797_v61, %v765_v11  ;;  %v912_v3 = vld [vmem:[#allocation2 + $0x1a] sm:$0x3f]  ;;  %v2396_v13 = vld [vmem:[#allocation2 + $0xc8] sm:$0x3f] }
  0xa3   : > { %v826_v32 = vadd.f32 %v798_v6, %v766_v27  ;;  %v827_v52 = vadd.f32 %v799_v51, %v767_v2  ;;  %v856_v58 = vmul.f32 %v1866_v56, %v2910_v30  ;;  %v945_v41 = vmul.f32 %v1947_v49, %v909_v33  ;;  %v911_v27 = vld [vmem:[#allocation2 + $0x12] sm:$0xff] }
  0xa4   : > { %v882_v17 = vadd.f32 %v854_v8, %v822_v47  ;;  %v855_v57 = vmul.f32 %v1866_v56, %v703_v7  ;;  %v857_v5 = vmul.f32 %v1866_v56, %v2909_v62  ;;  %v858_v50 = vmul.f32 %v1866_v56, %v2914_v25  ;;  %v2915_v2 = vld [vmem:[#allocation24_spill] sm:$0xff]  ;;  %v2916_v47 = vld [vmem:[#allocation9_spill] sm:$0xff]  ;;  %v2917_v25 = vld [vmem:[#allocation10_spill] sm:$0xff] }
  0xa5   : > { %v955_v6 = vmul.f32 %v1947_v49, %v2382_v59  ;;  %v859_v30 = vmul.f32 %v1866_v56, %v2913_v23  ;;  %v884_v11 = vadd.f32 %v856_v58, %v824_v40  ;;  %v946_v61 = vmul.f32 %v1947_v49, %v910_v39  ;;  %v913_v39 = vld [vmem:[#allocation2 + $0x22] sm:$0xff] }
  0xa6   : > { %v973_v7 = vadd.f32 %v945_v41, %v881_v29  ;;  %v828_v51 = vadd.f32 %v2915_v2, %v768_v16  ;;  %v829_v62 = vadd.f32 %v801_v53, %v769_v35  ;;  %v861_v44 = vmul.f32 %v1866_v56, %v2916_v47  ;;  %v914_v16 = vld [vmem:[#allocation2 + $0x2a] sm:$0x3f] }
  0xa7   : > { %v883_v33 = vadd.f32 %v855_v57, %v823_v15  ;;  %v2405_v21 = vadd.f32 %v2274_v20, %v688_v18  ;;  %v948_v26 = vmul.f32 %v1947_v49, %v912_v3  ;;  %v974_v8 = vadd.f32 %v946_v61, %v882_v17  ;;  %v915_v20 = vld [vmem:[#allocation2 + $0x32] sm:$0xff]  ;;  %v916_v18 = vld [vmem:[#allocation2 + $0x3a] sm:$0x3f] }
  0xa8   : > { %v983_v23 = vadd.f32 %v955_v6, %v2917_v25  ;;  %v2411_v40 = vmul.f32 %v1843_v48, %v2396_v13  ;;  %v885_v29 = vadd.f32 %v857_v5, %v825_v45  ;;  %v947_v35 = vmul.f32 %v1947_v49, %v911_v27  ;;  %v2918_v57 = vld [vmem:[#allocation25_spill] sm:$0xff]  ;;  %v917_v25 = vld [vmem:[#allocation2 + $0x42] sm:$0xff]  ;;  %v918_v45 = vld [vmem:[#allocation2 + $0x4a] sm:$0x3f] }
  0xa9   : > { %v1005_v53 = vmul.f32 %v1952_v60, %v911_v27  ;;  %v886_v15 = vadd.f32 %v858_v50, %v826_v32  ;;  %v887_v58 = vadd.f32 %v859_v30, %v827_v52  ;;  %v976_v41 = vadd.f32 %v948_v26, %v884_v11 }
  0xaa   : > { %v1006_v17 = vmul.f32 %v1952_v60, %v912_v3  ;;  %v888_v6 = vadd.f32 %v2918_v57, %v828_v51  ;;  %v889_v61 = vadd.f32 %v861_v44, %v829_v62  ;;  %v975_v2 = vadd.f32 %v947_v35, %v883_v33 }
  0xab   : > { %v1033_v47 = vadd.f32 %v1005_v53, %v973_v7  ;;  %v949_v5 = vmul.f32 %v1947_v49, %v913_v39  ;;  %v950_v34 = vmul.f32 %v1947_v49, %v914_v16  ;;  %v1008_v27 = vmul.f32 %v1952_v60, %v914_v16 }
  0xac   : > { %v1034_v32 = vadd.f32 %v1006_v17, %v974_v8  ;;  %v951_v52 = vmul.f32 %v1947_v49, %v915_v20  ;;  %v952_v50 = vmul.f32 %v1947_v49, %v916_v18  ;;  %v1007_v3 = vmul.f32 %v1952_v60, %v913_v39 }
  0xad   : > { %v1043_v30 = vadd.f32 %v2194_v28, %v983_v23  ;;  %v978_v11 = vadd.f32 %v950_v34, %v886_v15  ;;  %v1036_v51 = vadd.f32 %v1008_v27, %v976_v41  ;;  %v1065_v7 = vmul.f32 %v1971_v0, %v913_v39 }
  0xae   : > { %v1066_v62 = vmul.f32 %v1971_v0, %v914_v16  ;;  %v953_v44 = vmul.f32 %v1947_v49, %v917_v25  ;;  %v954_v33 = vmul.f32 %v1947_v49, %v918_v45  ;;  %v977_v26 = vadd.f32 %v949_v5, %v885_v29 }
  0xaf   : > { %v1035_v8 = vadd.f32 %v1007_v3, %v975_v2  ;;  %v1010_v35 = vmul.f32 %v1952_v60, %v916_v18  ;;  %v1068_v53 = vmul.f32 %v1971_v0, %v916_v18  ;;  %v2430_v17 = vadd.f32 %v1065_v7, %v1033_v47 }
  0xb0   : > { %v2432_v57 = vadd.f32 %v1066_v62, %v1034_v32  ;;  %v979_v28 = vadd.f32 %v951_v52, %v887_v58  ;;  %v980_v34 = vadd.f32 %v952_v50, %v888_v6  ;;  %v1009_v23 = vmul.f32 %v1952_v60, %v915_v20  ;;  %v2919_v62 = vld [vmem:[#allocation26_spill] sm:$0xff] }
  0xb1   : > { %v1067_v39 = vmul.f32 %v1971_v0, %v915_v20  ;;  %v1038_v16 = vadd.f32 %v1010_v35, %v978_v11  ;;  %v2436_v15 = vadd.f32 %v1068_v53, %v1036_v51  ;;  %v2439_v29 = vadd.f32 %v2238_v4, %v1043_v30 }
  0xb2   : > { %v1122_v41 = vsel %vm1121_vm0, %v2432_v57, 0.0  ;;  %v981_v18 = vadd.f32 %v953_v44, %v889_v61  ;;  %v1037_v2 = vadd.f32 %v1009_v23, %v977_v26  ;;  %v982_v6 = vadd.f32 %v954_v33, %v2233_v24  ;;  %v2920_v23 = vld [vmem:[#allocation29_spill] sm:$0xff] }
  0xb3   : > { %v2443_v47 = vadd.f32 %v1067_v39, %v1035_v8  ;;  %v1123_v58 = vadd.f32 %v1122_v41, %v2430_v17  ;;  %v1011_v5 = vmul.f32 %v1952_v60, %v917_v25  ;;  %v1012_v20 = vmul.f32 %v1952_v60, %v918_v45 }
  0xb4   : > { %v1070_v27 = vmul.f32 %v1971_v0, %v918_v45  ;;  %v1069_v4 = vmul.f32 %v1971_v0, %v917_v25  ;;  %v1169_v61 = vmul.f32 %v2430_v17, %v2430_v17  ;;  %v1170_v52 = vmul.f32 %v2432_v57, %v2432_v57 }
  0xb5   : > { %v1124_v32 = vadd.f32 %v1123_v58, %v2443_v47  ;;  %v1013_v50 = vmul.f32 %v1952_v60, %v2382_v59  ;;  %v1040_v24 = vadd.f32 %v1012_v20, %v980_v34  ;;  %v1125_v30 = vsel %vm1121_vm0, %v2436_v15, 0.0 }
  0xb6   : > { %v2458_v3 = vadd.f32 %v1070_v27, %v1038_v16  ;;  %v1039_v45 = vadd.f32 %v1011_v5, %v979_v28  ;;  %v1071_v25 = vmul.f32 %v1971_v0, %v2382_v59  ;;  %v2464_v11 = vadd.f32 %v1069_v4, %v1037_v2  ;;  %v540_v28 = vld [vmem:[#allocation2 + $0xd8] sm:$0x3f]  ;;  %v2921_v2 = vld [vmem:[#allocation11_spill] sm:$0xff] }
  0xb7   : > { %v1126_v51 = vadd.f32 %v1125_v30, %v1124_v32  ;;  %v604_v7 = vmul.f32 %v1911_v14, %v2396_v13  ;;  %v1072_v44 = vmul.f32 %v1971_v0, %v2919_v62  ;;  %v1172_v33 = vmul.f32 %v2436_v15, %v2436_v15 }
  0xb8   : > { %v1197_v26 = vsel %vm1121_vm0, %v1170_v52, 0.0  ;;  %v690_v8 = vadd.f32 %v2411_v40, %v2347_v19  ;;  %v1171_v59 = vmul.f32 %v2443_v47, %v2443_v47  ;;  %v1041_v34 = vadd.f32 %v1013_v50, %v981_v18 }
  0xb9   : > { %v1127_v35 = vadd.f32 %v1126_v51, %v2464_v11  ;;  %v1198_v53 = vadd.f32 %v1197_v26, %v1169_v61  ;;  %v1042_v39 = vadd.f32 %v2920_v23, %v982_v6  ;;  %v2479_v16 = vadd.f32 %v1072_v44, %v1040_v24  ;;  %v542_v24 = vld [vmem:[#allocation2 + $0xe8] sm:$0x3f] }
  0xba   : > { %v1128_v41 = vsel %vm1121_vm0, %v2458_v3, 0.0  ;;  %v1073_v58 = vmul.f32 %v1971_v0, %v2921_v2  ;;  %v2485_v5 = vadd.f32 %v1071_v25, %v1039_v45  ;;  %v840_v20 = vadd.f32 %v2298_v43, %v2405_v21 }
  0xbb   : > { %v1129_v19 = vadd.f32 %v1128_v41, %v1127_v35  ;;  %v1199_v40 = vadd.f32 %v1198_v53, %v1171_v59  ;;  %v632_v27 = vadd.f32 %v604_v7, %v2333_v22  ;;  %v1174_v18 = vmul.f32 %v2458_v3, %v2458_v3  ;;  %v722_v7 = vld [vmem:[#allocation2 + $0xc9] sm:$0x3f]  ;;  %v932_v59 = vld [vmem:[#allocation2 + $0xba] sm:$0x3f] }
  0xbc   : > { %v1200_v6 = vsel %vm1121_vm0, %v1172_v33, 0.0  ;;  %v664_v4 = vmul.f32 %v1843_v48, %v540_v28  ;;  %v1173_v0 = vmul.f32 %v2464_v11, %v2464_v11  ;;  %v574_v52 = vmul.f32 %v1831_v42, %v2396_v13 }
  0xbd   : > { %v1130_v32 = vadd.f32 %v1129_v19, %v2485_v5  ;;  %v1201_v61 = vadd.f32 %v1200_v6, %v1199_v40  ;;  %v606_v43 = vmul.f32 %v1911_v14, %v540_v28  ;;  %v2501_v22 = vadd.f32 %v2225_v38, %v1042_v39 }
  0xbe   : > { %v1131_v21 = vsel %vm1121_vm0, %v2479_v16, 0.0  ;;  %v782_v50 = vadd.f32 %v2292_v1, %v690_v8  ;;  %v2506_v30 = vadd.f32 %v1073_v58, %v1041_v34  ;;  %v900_v51 = vadd.f32 %v2376_v31, %v840_v20 }
  0xbf   : > { %v1132_v45 = vadd.f32 %v1131_v21, %v1130_v32  ;;  %v1202_v25 = vadd.f32 %v1201_v61, %v1173_v0  ;;  %v576_v13 = vmul.f32 %v1831_v42, %v540_v28  ;;  %v1176_v62 = vmul.f32 %v2479_v16, %v2479_v16 }
  0xc0   : > { %v1203_v38 = vsel %vm1121_vm0, %v1174_v18, 0.0  ;;  %v692_v44 = vadd.f32 %v664_v4, %v632_v27  ;;  %v1175_v1 = vmul.f32 %v2485_v5, %v2485_v5  ;;  %v634_v8 = vadd.f32 %v606_v43, %v574_v52 }
  0xc1   : > { %v1133_v33 = vadd.f32 %v1132_v45, %v2506_v30  ;;  %v1204_v26 = vadd.f32 %v1203_v38, %v1202_v25  ;;  %v608_v35 = vmul.f32 %v1911_v14, %v542_v24  ;;  %v666_v31 = vmul.f32 %v1843_v48, %v542_v24  ;;  %v724_v48 = vld [vmem:[#allocation2 + $0xd9] sm:$0x3f]  ;;  %v2922_v24 = vld [vmem:[#allocation12_spill] sm:$0xff] }
  0xc2   : > { %v1134_v42 = vsel %vm1121_vm0, %v2501_v22, 0.0  ;;  %v842_v53 = vadd.f32 %v2345_v12, %v782_v50  ;;  %v874_v28 = vmul.f32 %v1866_v56, %v722_v7  ;;  %v968_v39 = vmul.f32 %v1947_v49, %v932_v59 }
  0xc3   : > { %v1135_v34 = vadd.f32 %v1134_v42, %v1133_v33  ;;  %v1205_v23 = vadd.f32 %v1204_v26, %v1175_v1  ;;  %v816_v41 = vmul.f32 %v1863_v55, %v722_v7  ;;  %v1178_v2 = vmul.f32 %v2501_v22, %v2501_v22  ;;  %v726_v33 = vld [vmem:[#allocation2 + $0xe9] sm:$0x3f] }
  0xc4   : > { %v1206_v14 = vsel %vm1121_vm0, %v1176_v62, 0.0  ;;  %v784_v58 = vadd.f32 %v2342_v36, %v692_v44  ;;  %v1177_v12 = vmul.f32 %v2506_v30, %v2506_v30  ;;  %v758_v20 = vmul.f32 %v1860_v54, %v722_v7 }
  0xc5   : > { %v1136_v19 = vadd.f32 %v1135_v34, %v2439_v29  ;;  %v1207_v40 = vadd.f32 %v1206_v14, %v1205_v23  ;;  %v636_v27 = vadd.f32 %v608_v35, %v576_v13  ;;  %v694_v18 = vadd.f32 %v666_v31, %v634_v8  ;;  %v2923_v13 = vld [vmem:[#allocation14_spill] sm:$0xff]  ;;  %v2924_v8 = vld [vmem:[#allocation37_spill] sm:$0xff]  ;;  %v934_v14 = vld [vmem:[#allocation2 + $0xca] sm:$0x3f] }
  0xc6   : > { %v1137_v6 = vsel %vm1121_vm0, %v2270_v46, 0.0  ;;  %v992_v4 = vadd.f32 %v2284_v37, %v900_v51  ;;  %v902_v32 = vadd.f32 %v874_v28, %v842_v53  ;;  %v760_v36 = vmul.f32 %v1860_v54, %v724_v48  ;;  %v2554_v31 = vld [vmem:[%s1811_s20 + $0x8] ss:$0 sm:$0xff]  ;;  %v2925_v53 = vld [vmem:[#allocation36_spill] sm:$0xff] }
  0xc7   : > { %v1138_v0 = vadd.f32 %v1137_v6, %v1136_v19  ;;  %v1208_v61 = vadd.f32 %v1207_v40, %v1177_v12  ;;  %v876_v52 = vmul.f32 %v1866_v56, %v724_v48  ;;  %v1180_v43 = vmul.f32 %v2270_v46, %v2270_v46  ;;  %v2927_v40 = vld [vmem:[#allocation34_spill] sm:$0xff] }
  0xc8   : > { %v1209_v21 = vsel %vm1121_vm0, %v1178_v2, 0.0  ;;  %v844_v50 = vadd.f32 %v816_v41, %v784_v58  ;;  %v1179_v25 = vmul.f32 %v2439_v29, %v2439_v29  ;;  %v818_v51 = vmul.f32 %v1863_v55, %v724_v48  ;;  %v2926_v41 = vld [vmem:[#allocation13_spill] sm:$0xff] }
  0xc9   : > { %v1139_v45 = vadd.f32 %v1138_v0, %v2922_v24  ;;  %v1210_v37 = vadd.f32 %v1209_v21, %v1208_v61  ;;  %v786_v7 = vadd.f32 %v758_v20, %v694_v18  ;;  %v696_v54 = vadd.f32 %v2923_v13, %v636_v27  ;;  %v2928_v27 = vld [vmem:[#allocation38_spill] sm:$0xff]  ;;  %v2929_v0 = vld [vmem:[#allocation33_spill] sm:$0xff] }
  0xca   : > { %v1140_v62 = vsel %vm1121_vm0, %v2258_v63, 0.0  ;;  %v2549_v38 = vadd.f32 %v2313_v10, %v2373_v9  ;;  %v1026_v44 = vmul.f32 %v1952_v60, %v932_v59  ;;  %v1052_v35 = vadd.f32 %v2924_v8, %v992_v4  ;;  %v2931_v8 = vld [vmem:[#allocation27_spill] sm:$0xff] }
  0xcb   : > { %v1141_v1 = vadd.f32 %v1140_v62, %v1139_v45  ;;  %v1211_v26 = vadd.f32 %v1210_v37, %v1179_v25  ;;  %v1084_v42 = vmul.f32 %v2554_v31, %v932_v59  ;;  %v994_v28 = vadd.f32 %v2925_v53, %v902_v32 }
  0xcc   : > { %v1212_v34 = vsel %vm1121_vm0, %v1180_v43, 0.0  ;;  %v904_v23 = vadd.f32 %v876_v52, %v844_v50  ;;  %v1181_v10 = vmul.f32 %v2922_v24, %v2922_v24  ;;  %v820_v48 = vmul.f32 %v1863_v55, %v726_v33  ;;  %v2930_v52 = vld [vmem:[#allocation23_spill] sm:$0xff] }
  0xcd   : > { %v1142_v2 = vadd.f32 %v1141_v1, %v2926_v41  ;;  %v1213_v9 = vadd.f32 %v1212_v34, %v1211_v26  ;;  %v846_v58 = vadd.f32 %v818_v51, %v786_v7  ;;  %v878_v19 = vmul.f32 %v1866_v56, %v726_v33  ;;  %v936_v7 = vld [vmem:[#allocation2 + $0xda] sm:$0x3f] }
  0xce   : > { %v788_v12 = vadd.f32 %v760_v36, %v696_v54  ;;  %v1183_v59 = vmul.f32 %v2926_v41, %v2926_v41  ;;  %v1184_v20 = vmul.f32 %v2927_v40, %v2927_v40  ;;  %v1146_v4 = vsel %vm1121_vm0, %v2549_v38, 0.0 }
  0xcf   : > { %v1144_v18 = vadd.f32 %v2928_v27, %v1142_v2  ;;  %v1214_v6 = vadd.f32 %v1213_v9, %v1181_v10  ;;  %v2571_v32 = vadd.f32 %v1084_v42, %v1052_v35  ;;  %v970_v55 = vmul.f32 %v1947_v49, %v934_v14  ;;  %v938_v10 = vld [vmem:[#allocation2 + $0xea] sm:$0x3f] }
  0xd0   : > { %v1215_v56 = vsel %vm1121_vm0, %v2929_v0, 0.0  ;;  %v1054_v61 = vadd.f32 %v1026_v44, %v994_v28  ;;  %v1086_v36 = vmul.f32 %v2554_v31, %v934_v14  ;;  %v1028_v50 = vmul.f32 %v1952_v60, %v934_v14  ;;  %v940_v0 = vld [vmem:[#allocation2 + $0xfa] sm:$0x3f] }
  0xd1   : > { %v1145_v43 = vadd.f32 %v1144_v18, %v2930_v52  ;;  %v1216_v21 = vadd.f32 %v1215_v56, %v1214_v6  ;;  %v996_v45 = vadd.f32 %v968_v39, %v904_v23  ;;  %v906_v25 = vadd.f32 %v878_v19, %v846_v58  ;;  %v2932_v23 = vld [vmem:[#allocation15_spill] sm:$0xff] }
  0xd2   : > { %v848_v37 = vadd.f32 %v820_v48, %v788_v12  ;;  %v1218_v51 = vsel %vm1121_vm0, %v1184_v20, 0.0  ;;  %v1185_v62 = vmul.f32 %v2930_v52, %v2930_v52  ;;  %v1186_v44 = vmul.f32 %v2549_v38, %v2549_v38 }
  0xd3   : > { %v1147_v13 = vadd.f32 %v1146_v4, %v1145_v43  ;;  %v1217_v54 = vadd.f32 %v1216_v21, %v1183_v59  ;;  %v1149_v33 = vsel %vm1121_vm0, %v2571_v32, 0.0  ;;  %v972_v1 = vmul.f32 %v1947_v49, %v936_v7  ;;  %v2933_v59 = vld [vmem:[#allocation30_spill] sm:$0xff]  ;;  %v2934_v21 = vld [vmem:[#allocation31_spill] sm:$0xff] }
  0xd4   : > { %v2587_v26 = vadd.f32 %v1086_v36, %v1054_v61  ;;  %v1030_v39 = vmul.f32 %v1952_v60, %v936_v7  ;;  %v1056_v53 = vadd.f32 %v1028_v50, %v996_v45  ;;  %v1088_v28 = vmul.f32 %v2554_v31, %v936_v7 }
  0xd5   : > { %v1148_v35 = vadd.f32 %v1147_v13, %v2931_v8  ;;  %v1219_v42 = vadd.f32 %v1218_v51, %v1217_v54  ;;  %v998_v34 = vadd.f32 %v970_v55, %v906_v25  ;;  %v908_v2 = vadd.f32 %v2932_v23, %v848_v37 }
  0xd6   : > { %v1221_v48 = vsel %vm1121_vm0, %v1186_v44, 0.0  ;;  %v1187_v49 = vmul.f32 %v2931_v8, %v2931_v8  ;;  %v1188_v58 = vmul.f32 %v2571_v32, %v2571_v32  ;;  %v1152_v19 = vsel %vm1121_vm0, %v2587_v26, 0.0 }
  0xd7   : > { %v1150_v9 = vadd.f32 %v1149_v33, %v1148_v35  ;;  %v1220_v14 = vadd.f32 %v1219_v42, %v1185_v62  ;;  %v1032_v12 = vmul.f32 %v1952_v60, %v938_v10  ;;  %v2602_v18 = vadd.f32 %v1088_v28, %v1056_v53 }
  0xd8   : > { %v1058_v6 = vadd.f32 %v1030_v39, %v998_v34  ;;  %v1090_v4 = vmul.f32 %v2554_v31, %v938_v10  ;;  %v1000_v55 = vadd.f32 %v972_v1, %v908_v2  ;;  %v1224_v36 = vsel %vm1121_vm0, %v1188_v58, 0.0  ;;  %v2935_v1 = vld [vmem:[#allocation32_spill] sm:$0xff]  ;;  %v2936_v10 = vld [vmem:[#allocation35_spill] sm:$0xff] }
  0xd9   : > { %v1151_v20 = vadd.f32 %v1150_v9, %v2933_v59  ;;  %v1222_v27 = vadd.f32 %v1221_v48, %v1220_v14  ;;  %v1190_v43 = vmul.f32 %v2587_v26, %v2587_v26  ;;  %v1189_v60 = vmul.f32 %v2933_v59, %v2933_v59 }
  0xda   : > { %v1092_v25 = vmul.f32 %v2554_v31, %v940_v0  ;;  %v1155_v37 = vsel %vm1121_vm0, %v2602_v18, 0.0  ;;  %v2614_v51 = vadd.f32 %v1090_v4, %v1058_v6  ;;  %v1060_v7 = vadd.f32 %v1032_v12, %v1000_v55 }
  0xdb   : > { %v1153_v56 = vadd.f32 %v1152_v19, %v1151_v20  ;;  %v1223_v61 = vadd.f32 %v1222_v27, %v1187_v49  ;;  %v1227_v62 = vsel %vm1121_vm0, %v1190_v43, 0.0  ;;  %v1192_v44 = vmul.f32 %v2602_v18, %v2602_v18 }
  0xdc   : > { %v1191_v33 = vmul.f32 %v2934_v21, %v2934_v21  ;;  %v1158_v31 = vsel %vm1121_vm0, %v2614_v51, 0.0  ;;  %v2624_v42 = vadd.f32 %v1092_v25, %v1060_v7  ;;  %v1194_v23 = vmul.f32 %v2614_v51, %v2614_v51 }
  0xdd   : > { %v1154_v50 = vadd.f32 %v1153_v56, %v2934_v21  ;;  %v1225_v45 = vadd.f32 %v1224_v36, %v1223_v61  ;;  %v1230_v34 = vsel %vm1121_vm0, %v1192_v44, 0.0  ;;  %v1193_v2 = vmul.f32 %v2935_v1, %v2935_v1 }
  0xde   : > { %v1161_v48 = vsel %vm1121_vm0, %v2624_v42, 0.0  ;;  %v1233_v19 = vsel %vm1121_vm0, %v1194_v23, 0.0  ;;  %v1196_v12 = vmul.f32 %v2624_v42, %v2624_v42  ;;  %v1195_v20 = vmul.f32 %v2936_v10, %v2936_v10 }
  0xdf   : > { %v1156_v13 = vadd.f32 %v1155_v37, %v1154_v50  ;;  %v1226_v54 = vadd.f32 %v1225_v45, %v1189_v60 }
  0xe0   : > { %v1236_v0 = vsel %vm1121_vm0, %v1196_v12, 0.0 }
  0xe1   : > { %v1157_v39 = vadd.f32 %v1156_v13, %v2935_v1  ;;  %v1228_v35 = vadd.f32 %v1227_v62, %v1226_v54 }
  0xe3   : > { %v1159_v53 = vadd.f32 %v1158_v31, %v1157_v39  ;;  %v1229_v28 = vadd.f32 %v1228_v35, %v1191_v33  ;;  %v1252_v31 = vld [vmem:[%s418_s26] sm:$0x1] }
  0xe5   : > { %v1160_v9 = vadd.f32 %v1159_v53, %v2936_v10  ;;  %v1231_v14 = vadd.f32 %v1230_v34, %v1229_v28  ;;  %v1254_v34 = vld [vmem:[%s421_s29] sm:$0x1] }
  0xe7   : > { %v1162_v49 = vadd.f32 %v1161_v48, %v1160_v9  ;;  %v1232_v58 = vadd.f32 %v1231_v14, %v1193_v2  ;;  %v2937_v2 = vld [vmem:[#allocation6_spill] sm:$0xff] }
  0xe9   : > { %v1163_v27 = vrot.slane %v1162_v49, 4  ;;  %v1234_v6 = vadd.f32 %v1233_v19, %v1232_v58 }
  0xeb   : > { %v1164_v4 = vadd.f32 %v1163_v27, %v1162_v49  ;;  %v1235_v55 = vadd.f32 %v1234_v6, %v1195_v20 }
  0xed   : > { %v1165_v56 = vrot.slane %v1164_v4, 2  ;;  %v1237_v61 = vadd.f32 %v1236_v0, %v1235_v55 }
  0xef   : > { %v1166_v36 = vadd.f32 %v1165_v56, %v1164_v4  ;;  %v1238_v43 = vrot.slane %v1237_v61, 4 }
  0xf1   : > { %v1167_v60 = vrot.slane %v1166_v36, 1  ;;  %v1239_v50 = vadd.f32 %v1238_v43, %v1237_v61 }
  0xf3   : > { %v1168_v45 = vadd.f32 %v1167_v60, %v1166_v36  ;;  %v1240_v25 = vrot.slane %v1239_v50, 2 }
  0xf5   : > { %v1241_v37 = vadd.f32 %v1240_v25, %v1239_v50  ;;  %v1245_v7 = vmul.f32 0.0051020407, %v1168_v45 }
  0xf7   : > { %v1242_v13 = vrot.slane %v1241_v37, 1  ;;  %v1247_v62 = vmul.f32 %v1245_v7, %v1245_v7 }
  0xf9   : > { %v1243_v54 = vadd.f32 %v1242_v13, %v1241_v37 }
  0xfb   : > { %v1246_v44 = vmul.f32 0.0051020407, %v1243_v54 }
  0xfd   : > { %v1248_v33 = vsub.f32 %v1246_v44, %v1247_v62 }
  0xff   : > { %v1249_v39 = vmax.f32 %v1248_v33, 0.0 }
 0x101   : > { %v1250_v35 = vadd.f32 0.001, %v1249_v39 }
 0x103   : > { %1633 = vrsqrt.f32 %v1250_v35 }
 0x110   : > { %v1634_v53 = vpop.eup %1633 }
 0x111   : > { %v1253_v28 = vmul.f32 %v1634_v53, %v1252_v31 }
 0x113   : > { %v1255_v23 = vmul.f32 %v1253_v28, %v1245_v7  ;;  %v2649_v9 = vrot.slane %v1253_v28, %v2937_v2 }
 0x115   : > { %v1256_v14 = vsub.f32 %v1254_v34, %v1255_v23  ;;  %v1261_v48 = vmul.f32 %v2649_v9, %v2430_v17  ;;  %v1262_v49 = vmul.f32 %v2649_v9, %v2432_v57  ;;  %v1263_v58 = vmul.f32 %v2649_v9, %v2443_v47 }
 0x116   : > { %v1264_v19 = vmul.f32 %v2649_v9, %v2436_v15  ;;  %v1265_v12 = vmul.f32 %v2649_v9, %v2464_v11  ;;  %v1266_v20 = vmul.f32 %v2649_v9, %v2458_v3  ;;  %v1267_v27 = vmul.f32 %v2649_v9, %v2485_v5 }
 0x117   : > { %v2666_v17 = vrot.slane %v1256_v14, %v2937_v2  ;;  %v1268_v57 = vmul.f32 %v2649_v9, %v2479_v16  ;;  %v1269_v47 = vmul.f32 %v2649_v9, %v2506_v30  ;;  %v1270_v15 = vmul.f32 %v2649_v9, %v2501_v22 }
 0x118   : > { %v1271_v11 = vmul.f32 %v2649_v9, %v2439_v29  ;;  %v1272_v3 = vmul.f32 %v2649_v9, %v2270_v46  ;;  %v1273_v5 = vmul.f32 %v2649_v9, %v2922_v24  ;;  %v1274_v6 = vmul.f32 %v2649_v9, %v2258_v63 }
 0x119   : > { %v1295_v16 = vadd.f32 %v2666_v17, %v1261_v48  ;;  %v1296_v4 = vadd.f32 %v2666_v17, %v1262_v49  ;;  %v1297_v30 = vadd.f32 %v2666_v17, %v1263_v58  ;;  %v1298_v22 = vadd.f32 %v2666_v17, %v1264_v19 }
 0x11a   : > { %v1299_v55 = vadd.f32 %v2666_v17, %v1265_v12  ;;  %v1300_v29 = vadd.f32 %v2666_v17, %v1266_v20  ;;  %v1301_v46 = vadd.f32 %v2666_v17, %v1267_v27  ;;  %v1302_v0 = vadd.f32 %v2666_v17, %v1268_v57 }
 0x11b   : > { %1323 = vst [vmem:[%s2691_s30] sm:$0xff] %v1295_v16  ;;  %1324 = vst [vmem:[%s2691_s30 + $0x8] sm:$0x3f] %v1296_v4  ;;  %v1303_v63 = vadd.f32 %v2666_v17, %v1269_v47  ;;  %v1304_v24 = vadd.f32 %v2666_v17, %v1270_v15  ;;  %v1305_v56 = vadd.f32 %v2666_v17, %v1271_v11 }
 0x11c   : > { %1325 = vst [vmem:[%s2691_s30 + $0x10] sm:$0xff] %v1297_v30  ;;  %1326 = vst [vmem:[%s2691_s30 + $0x18] sm:$0x3f] %v1298_v22  ;;  %v1306_v61 = vadd.f32 %v2666_v17, %v1272_v3  ;;  %v1307_v36 = vadd.f32 %v2666_v17, %v1273_v5  ;;  %v1308_v43 = vadd.f32 %v2666_v17, %v1274_v6 }
 0x11d   : > { %1327 = vst [vmem:[%s2691_s30 + $0x20] sm:$0xff] %v1299_v55  ;;  %1328 = vst [vmem:[%s2691_s30 + $0x28] sm:$0x3f] %v1300_v29  ;;  %v1275_v60 = vmul.f32 %v2649_v9, %v2926_v41  ;;  %v1276_v50 = vmul.f32 %v2649_v9, %v2927_v40  ;;  %v1277_v45 = vmul.f32 %v2649_v9, %v2930_v52 }
 0x11e   : > { %1329 = vst [vmem:[%s2691_s30 + $0x30] sm:$0xff] %v1301_v46  ;;  %1330 = vst [vmem:[%s2691_s30 + $0x38] sm:$0x3f] %v1302_v0  ;;  %v1278_v25 = vmul.f32 %v2649_v9, %v2549_v38  ;;  %v1279_v37 = vmul.f32 %v2649_v9, %v2931_v8  ;;  %v1280_v41 = vmul.f32 %v2649_v9, %v2571_v32 }
 0x11f   : > { %1331 = vst [vmem:[%s2691_s30 + $0x40] sm:$0xff] %v1303_v63  ;;  %1332 = vst [vmem:[%s2691_s30 + $0x48] sm:$0x3f] %v1304_v24  ;;  %v1309_v40 = vadd.f32 %v2666_v17, %v1275_v60  ;;  %v1310_v7 = vadd.f32 %v2666_v17, %v1276_v50  ;;  %v1281_v52 = vmul.f32 %v2649_v9, %v2933_v59 }
 0x120   : > { %1333 = vst [vmem:[%s2691_s30 + $0x50] sm:$0xff] %v1305_v56  ;;  %1334 = vst [vmem:[%s2691_s30 + $0x58] sm:$0x3f] %v1306_v61  ;;  %v1282_v38 = vmul.f32 %v2649_v9, %v2587_v26  ;;  %v1311_v8 = vadd.f32 %v2666_v17, %v1277_v45  ;;  %v1312_v32 = vadd.f32 %v2666_v17, %v1278_v25 }
 0x121   : > { %1335 = vst [vmem:[%s2691_s30 + $0x60] sm:$0xff] %v1307_v36  ;;  %1336 = vst [vmem:[%s2691_s30 + $0x68] sm:$0x3f] %v1308_v43  ;;  %v1313_v13 = vadd.f32 %v2666_v17, %v1279_v37  ;;  %v1314_v54 = vadd.f32 %v2666_v17, %v1280_v41  ;;  %v1315_v62 = vadd.f32 %v2666_v17, %v1281_v52 }
 0x122   : > { %1337 = vst [vmem:[%s2691_s30 + $0x70] sm:$0xff] %v1309_v40  ;;  %1338 = vst [vmem:[%s2691_s30 + $0x78] sm:$0x3f] %v1310_v7  ;;  %v1316_v44 = vadd.f32 %v2666_v17, %v1282_v38  ;;  %v1283_v59 = vmul.f32 %v2649_v9, %v2934_v21  ;;  %v1284_v26 = vmul.f32 %v2649_v9, %v2602_v18 }
 0x123   : > { %1339 = vst [vmem:[%s2691_s30 + $0x80] sm:$0xff] %v1311_v8  ;;  %1340 = vst [vmem:[%s2691_s30 + $0x88] sm:$0x3f] %v1312_v32  ;;  %v1285_v33 = vmul.f32 %v2649_v9, %v2935_v1  ;;  %v1286_v39 = vmul.f32 %v2649_v9, %v2614_v51  ;;  %v1287_v21 = vmul.f32 %v2649_v9, %v2936_v10  ;;  %v1444_v10 = vld [vmem:[%s2691_s30 + $0x8] sm:$0xff] (%p1721_p5)  ;;  %v1446_v34 = vld [vmem:[%s2691_s30 + $0x10] sm:$0xff] (%p1721_p5) }
 0x124   : > { %1341 = vst [vmem:[%s2691_s30 + $0x90] sm:$0xff] %v1313_v13  ;;  %1342 = vst [vmem:[%s2691_s30 + $0x98] sm:$0x3f] %v1314_v54  ;;  %v1288_v18 = vmul.f32 %v2649_v9, %v2624_v42  ;;  %v1317_v35 = vadd.f32 %v2666_v17, %v1283_v59  ;;  %v1318_v31 = vadd.f32 %v2666_v17, %v1284_v26  ;;  %1357 = sbr.rel (!%p1721_p5) target bundleno = 311 (0x137), region = 116  ;;  %v1442_v42 = vld [vmem:[%s2691_s30] sm:$0xff] (%p1721_p5)  ;;  %v1448_v23 = vld [vmem:[%s2691_s30 + $0x18] sm:$0xff] (%p1721_p5) }
 0x125   : > { %1343 = vst [vmem:[%s2691_s30 + $0xa0] sm:$0xff] %v1315_v62  ;;  %1344 = vst [vmem:[%s2691_s30 + $0xa8] sm:$0x3f] %v1316_v44  ;;  %v1319_v53 = vadd.f32 %v2666_v17, %v1285_v33  ;;  %v1320_v1 = vadd.f32 %v2666_v17, %v1286_v39  ;;  %v1321_v28 = vadd.f32 %v2666_v17, %v1287_v21  ;;  %v1450_v2 = vld [vmem:[%s2691_s30 + $0x20] sm:$0xff] (%p1721_p5)  ;;  %v1452_v9 = vld [vmem:[%s2691_s30 + $0x28] sm:$0xff] (%p1721_p5) }
 0x126   : > { %v1322_v51 = vadd.f32 %v2666_v17, %v1288_v18  ;;  %1345 = vst [vmem:[%s2691_s30 + $0xb0] sm:$0xff] %v1317_v35  ;;  %1346 = vst [vmem:[%s2691_s30 + $0xb8] sm:$0x3f] %v1318_v31  ;;  %v1454_v14 = vld [vmem:[%s2691_s30 + $0x30] sm:$0xff] (%p1721_p5)  ;;  %v1456_v48 = vld [vmem:[%s2691_s30 + $0x38] sm:$0xff] (%p1721_p5) }
 0x127   : > { %1347 = vst [vmem:[%s2691_s30 + $0xc0] sm:$0xff] %v1319_v53  ;;  %1348 = vst [vmem:[%s2691_s30 + $0xc8] sm:$0x3f] %v1320_v1  ;;  %v1458_v49 = vld [vmem:[%s2691_s30 + $0x40] sm:$0xff] (%p1721_p5)  ;;  %v1460_v58 = vld [vmem:[%s2691_s30 + $0x48] sm:$0xff] (%p1721_p5) }
 0x128   : > { %1349 = vst [vmem:[%s2691_s30 + $0xd0] sm:$0xff] %v1321_v28  ;;  %1350 = vst [vmem:[%s2691_s30 + $0xd8] sm:$0x3f] %v1322_v51  ;;  %v1462_v19 = vld [vmem:[%s2691_s30 + $0x50] sm:$0xff] (%p1721_p5)  ;;  %v1464_v12 = vld [vmem:[%s2691_s30 + $0x58] sm:$0xff] (%p1721_p5) }
 0x129   : > { %1443 = vst [vmem:[%s2778_s8] sm:$0xff] %v1442_v42  ;;  %1445 = vst [vmem:[%s2778_s8 + $0x10] sm:$0xff] %v1444_v10  ;;  %v1466_v20 = vld [vmem:[%s2691_s30 + $0x60] sm:$0xff]  ;;  %v1468_v27 = vld [vmem:[%s2691_s30 + $0x68] sm:$0xff] }
 0x12a   : > { %1447 = vst [vmem:[%s2778_s8 + $0x20] sm:$0xff] %v1446_v34  ;;  %1449 = vst [vmem:[%s2778_s8 + $0x30] sm:$0xff] %v1448_v23  ;;  %v1470_v17 = vld [vmem:[%s2691_s30 + $0x70] sm:$0xff]  ;;  %v1472_v57 = vld [vmem:[%s2691_s30 + $0x78] sm:$0xff] }
 0x12b   : > { %1451 = vst [vmem:[%s2778_s8 + $0x40] sm:$0xff] %v1450_v2  ;;  %1453 = vst [vmem:[%s2778_s8 + $0x50] sm:$0xff] %v1452_v9  ;;  %v1474_v47 = vld [vmem:[%s2691_s30 + $0x80] sm:$0xff]  ;;  %v1476_v15 = vld [vmem:[%s2691_s30 + $0x88] sm:$0xff] }
 0x12c   : > { %1455 = vst [vmem:[%s2778_s8 + $0x60] sm:$0xff] %v1454_v14  ;;  %1457 = vst [vmem:[%s2778_s8 + $0x70] sm:$0xff] %v1456_v48  ;;  %v1478_v11 = vld [vmem:[%s2691_s30 + $0x90] sm:$0xff]  ;;  %v1480_v3 = vld [vmem:[%s2691_s30 + $0x98] sm:$0xff] }
 0x12d   : > { %1459 = vst [vmem:[%s2778_s8 + $0x80] sm:$0xff] %v1458_v49  ;;  %1461 = vst [vmem:[%s2778_s8 + $0x90] sm:$0xff] %v1460_v58  ;;  %v1482_v5 = vld [vmem:[%s2691_s30 + $0xa0] sm:$0xff]  ;;  %v1484_v6 = vld [vmem:[%s2691_s30 + $0xa8] sm:$0xff] }
 0x12e   : > { %1463 = vst [vmem:[%s2778_s8 + $0xa0] sm:$0xff] %v1462_v19  ;;  %1465 = vst [vmem:[%s2778_s8 + $0xb0] sm:$0xff] %v1464_v12  ;;  %v1486_v16 = vld [vmem:[%s2691_s30 + $0xb0] sm:$0xff]  ;;  %v1488_v4 = vld [vmem:[%s2691_s30 + $0xb8] sm:$0xff] }
 0x12f   : > { %1467 = vst [vmem:[%s2778_s8 + $0xc0] sm:$0xff] %v1466_v20  ;;  %1469 = vst [vmem:[%s2778_s8 + $0xd0] sm:$0xff] %v1468_v27  ;;  %v1490_v30 = vld [vmem:[%s2691_s30 + $0xc0] sm:$0xff]  ;;  %v1492_v22 = vld [vmem:[%s2691_s30 + $0xc8] sm:$0xff] }
 0x130   : > { %1471 = vst [vmem:[%s2778_s8 + $0xe0] sm:$0xff] %v1470_v17  ;;  %1473 = vst [vmem:[%s2778_s8 + $0xf0] sm:$0xff] %v1472_v57  ;;  %v1494_v55 = vld [vmem:[%s2691_s30 + $0xd0] sm:$0xff]  ;;  %v1496_v29 = vld [vmem:[%s2691_s30 + $0xd8] sm:$0xff] }
 0x131   : > { %1475 = vst [vmem:[%s2778_s8 + $0x100] sm:$0xff] %v1474_v47  ;;  %1477 = vst [vmem:[%s2778_s8 + $0x110] sm:$0xff] %v1476_v15 }
 0x132   : > { %1479 = vst [vmem:[%s2778_s8 + $0x120] sm:$0xff] %v1478_v11  ;;  %1481 = vst [vmem:[%s2778_s8 + $0x130] sm:$0xff] %v1480_v3 }
 0x133   : > { %1483 = vst [vmem:[%s2778_s8 + $0x140] sm:$0xff] %v1482_v5  ;;  %1485 = vst [vmem:[%s2778_s8 + $0x150] sm:$0xff] %v1484_v6 }
 0x134   : > { %1487 = vst [vmem:[%s2778_s8 + $0x160] sm:$0xff] %v1486_v16  ;;  %1489 = vst [vmem:[%s2778_s8 + $0x170] sm:$0xff] %v1488_v4 }
 0x135   : > { %1491 = vst [vmem:[%s2778_s8 + $0x180] sm:$0xff] %v1490_v30  ;;  %1493 = vst [vmem:[%s2778_s8 + $0x190] sm:$0xff] %v1492_v22 }
 0x136   : > { %1495 = vst [vmem:[%s2778_s8 + $0x1a0] sm:$0xff] %v1494_v55  ;;  %1497 = vst [vmem:[%s2778_s8 + $0x1b0] sm:$0xff] %v1496_v29 }
 0x137 PF: > { %p11_p11 = scmp.ge.s32.totalorder %s1705_s19, 4   ;;  %s2938_s15 = smov %s1654_s16 }
 0x138   : > { %s2939_s16 = smov %s1715_s22  ;;  %s2940_s17 = smov %s1705_s19 }
 0x139   :  { %13 = sbr.rel (!%p11_p11) target bundleno = 2 (0x2), region = 200 }

</bundles_post_ra>
